<compile_context>
chip_gen: v7x
topology: tpu7x:2x2x1
jax: 0.10.0
libtpu: 0.0.40
codegen_flags: <defaults>
</compile_context>

<pallas_src>
import functools

import jax
import jax.numpy as jnp
from jax.experimental import pallas as pl
from jax.experimental.pallas import tpu as pltpu

C_BACK = 32       # stand-in for backbone.num_channels (1024 in the real model)
HIDDEN = 16       # hidden_dim
NUM_SCALES = 4    # size of the scale-embedding table in EPF_extractor
POOL = 4          # backbone stand-in spatial stride (4x4 average pool)


# ----------------------------------------------------------------------------
# Host-side constant spatial operators (pool / blur are linear -> tiny matmuls)
# ----------------------------------------------------------------------------
def avgpool_matrix(H, W, k=POOL):
    """(H*W, (H//k)*(W//k)) matrix so that x_cf (C, H*W) @ P == k x k avg pool."""
    Ho, Wo = H // k, W // k
    hw = jnp.arange(H * W)
    hi, wi = hw // W, hw % W
    hwo = jnp.arange(Ho * Wo)
    ho, wo = hwo // Wo, hwo % Wo
    m = (hi[:, None] // k == ho[None, :]) & (wi[:, None] // k == wo[None, :])
    return m.astype(jnp.float32) / float(k * k)


def gauss3x3_matrix(H, W):
    """(H*W, H*W) symmetric matrix: x_cf (C, H*W) @ G == separable (1,2,1)^2/16
    Gaussian blur with zero padding (the low-pass inside make_laplace)."""
    hw = jnp.arange(H * W)
    hi, wi = hw // W, hw % W
    dh = hi[:, None] - hi[None, :]
    dw = wi[:, None] - wi[None, :]
    f = lambda d: jnp.where(d == 0, 2.0, jnp.where(jnp.abs(d) == 1, 1.0, 0.0))
    return ((f(dh) * f(dw)) / 16.0).astype(jnp.float32)


# ----------------------------------------------------------------------------
# In-kernel helpers (channel-first layout: channels on sublanes, space on lanes)
# ----------------------------------------------------------------------------
def _stem(x, w, b):
    """1x1 conv 3 -> C_BACK + ReLU via 3 VPU broadcast-FMAs.
    x: (3, S) lane-dense spatial, w: (C, 3), b: (C, 1) -> (C, S)."""
    y = (w[:, 0:1] * x[0:1, :] + w[:, 1:2] * x[1:2, :] + w[:, 2:3] * x[2:3, :]) + b
    return jnp.maximum(y, 0.0)


def _edge_enhance(pooled, gauss):
    """x + x * sigmoid(make_laplace(x)); blur applied as a constant matmul."""
    blurred = jnp.dot(pooled, gauss, preferred_element_type=jnp.float32)
    return pooled + pooled * jax.nn.sigmoid(pooled - blurred)


# ----------------------------------------------------------------------------
# Fused query branch + refiner + matcher + counter (one pallas_call, grid=(bs,))
# ----------------------------------------------------------------------------
def _query_match_kernel(x_ref, p_ref, pool_ref, gauss_ref,
                        wst_ref, bst_ref, wcs_ref, bcs_ref,
                        wpr_ref, bpr_ref, wrf_ref, brf_ref,
                        wcn_ref, bcn_ref, *out_refs, with_corr):
    # backbone stem on the raw (3, H*W) image, then 4x4 avg pool via matmul
    y = _stem(x_ref[0], wst_ref[...], bst_ref[...])                       # (C, HW)
    pooled = jnp.dot(y, pool_ref[...], preferred_element_type=jnp.float32)  # (C, HWq)
    # make_laplace edge enhancement
    enh = _edge_enhance(pooled, gauss_ref[...])                           # (C, HWq)
    # DACA stand-in: per-channel GAP -> sigmoid gate -> rescale
    feat_daca = enh * jax.nn.sigmoid(jnp.mean(enh, axis=1, keepdims=True))
    # CSFF(a, a) folded to a single 1x1 conv (w1+w2, b1+b2)
    feat_csff = (jnp.dot(wcs_ref[...], enh, preferred_element_type=jnp.float32)
                 + bcs_ref[...])
    feats = feat_csff + feat_daca                                         # (C, HWq)
    # input_proj (C_BACK -> hidden_dim); features stay in VMEM
    features = (jnp.dot(wpr_ref[...], feats, preferred_element_type=jnp.float32)
                + bpr_ref[...])                                           # (hid, HWq)
    # refiner: residual 1x1 + ReLU
    refined = features + jnp.maximum(
        jnp.dot(wrf_ref[...], features, preferred_element_type=jnp.float32)
        + brf_ref[...], 0.0)                                              # (hid, HWq)
    # matcher: correlation with exemplar features; gate = sigmoid(mean_P corr)
    corr = jnp.dot(p_ref[0], refined, preferred_element_type=jnp.float32)  # (P, HWq)
    gate = jax.nn.sigmoid(jnp.mean(corr, axis=0, keepdims=True))           # (1, HWq)
    counting = refined * gate                                              # (hid, HWq)
    # counter (hid -> 1, ReLU) as a VPU multiply + sublane reduce (lane-dense row)
    dens = jnp.sum(wcn_ref[...] * counting, axis=0, keepdims=True) + bcn_ref[...]
    out_refs[0][0] = jnp.maximum(dens, 0.0).astype(out_refs[0].dtype)
    if with_corr:   # correlation map only materialized to HBM during training
        out_refs[1][0] = corr.astype(out_refs[1].dtype)


def query_match(samples_cf, patch_feature, pool_q, gauss_q, params, Hq, Wq,
                with_corr):
    bs, _, HW = samples_cf.shape
    HWq = Hq * Wq
    P = patch_feature.shape[1]
    hid, C = HIDDEN, C_BACK

    # host-side weight folds / transposes (tiny, one-off)
    w_stem = params["backbone"]["w"].T                                   # (C, 3)
    b_stem = params["backbone"]["b"].reshape(C, 1)
    w_csff = (params["csff_query"]["w1"] + params["csff_query"]["w2"]).T  # (C, C)
    b_csff = (params["csff_query"]["b1"] + params["csff_query"]["b2"]).reshape(C, 1)
    w_proj = params["input_proj"]["w"].T                                  # (hid, C)
    b_proj = params["input_proj"]["b"].reshape(hid, 1)
    w_ref = params["refiner"]["w"].T                                      # (hid, hid)
    b_ref = params["refiner"]["b"].reshape(hid, 1)
    w_cnt = params["counter"]["w"].reshape(hid, 1)
    b_cnt = params["counter"]["b"].reshape(1, 1)

    shared = lambda shape: pl.BlockSpec(shape, lambda b: (0,) * len(shape))
    in_specs = [
        pl.BlockSpec((1, 3, HW), lambda b: (b, 0, 0)),
        pl.BlockSpec((1, P, hid), lambda b: (b, 0, 0)),
        shared((HW, HWq)), shared((HWq, HWq)),
        shared((C, 3)), shared((C, 1)),
        shared((C, C)), shared((C, 1)),
        shared((hid, C)), shared((hid, 1)),
        shared((hid, hid)), shared((hid, 1)),
        shared((hid, 1)), shared((1, 1)),
    ]
    dens_shape = jax.ShapeDtypeStruct((bs, 1, HWq), jnp.float32)
    dens_spec = pl.BlockSpec((1, 1, HWq), lambda b: (b, 0, 0))
    if with_corr:
        out_shape = (dens_shape, jax.ShapeDtypeStruct((bs, P, HWq), jnp.float32))
        out_specs = (dens_spec, pl.BlockSpec((1, P, HWq), lambda b: (b, 0, 0)))
    else:
        out_shape = dens_shape
        out_specs = dens_spec
    return pl.pallas_call(
        functools.partial(_query_match_kernel, with_corr=with_corr),
        out_shape=out_shape,
        grid=(bs,),
        in_specs=in_specs,
        out_specs=out_specs,
        compiler_params=pltpu.CompilerParams(dimension_semantics=("parallel",)),
    )(samples_cf, patch_feature, pool_q, gauss_q, w_stem, b_stem, w_csff, b_csff,
      w_proj, b_proj, w_ref, b_ref, w_cnt, b_cnt)


# ----------------------------------------------------------------------------
# Fused patch branch: stem + pool + edge enhance + GAP + (CSFF o EPF) fold
# ----------------------------------------------------------------------------
def _patch_kernel(x_ref, emb_ref, pool_ref, gauss_ref, wst_ref, bst_ref,
                  wse_ref, bse_ref, o_ref, gap_ref, *, num_patches, pooled_hw):
    x_all = x_ref[0]                                       # (P*3, hw)
    w = wst_ref[...]
    b = bst_ref[...]
    ones_row = jnp.full((1, pooled_hw), 1.0 / pooled_hw, dtype=jnp.float32)
    for p in range(num_patches):                           # static, P per grid step
        xp = x_all[3 * p:3 * p + 3, :]                     # (3, hw)
        y = _stem(xp, w, b)                                # (C, hw)
        pooled = jnp.dot(y, pool_ref[...], preferred_element_type=jnp.float32)
        enh = _edge_enhance(pooled, gauss_ref[...])        # (C, S)
        # GAP as a (1, C) row (contracting-(1,1) dot keeps channels on lanes)
        gap_ref[pl.ds(p, 1), :] = jax.lax.dot_general(
            ones_row, enh, (((1,), (1,)), ((), ())),
            preferred_element_type=jnp.float32)
    # batched tail: (GAP -> SimplifiedCSFF -> EPF linear) fold + scale embedding
    e = (jnp.dot(gap_ref[...], wse_ref[...], preferred_element_type=jnp.float32)
         + bse_ref[...])                                   # (P, hid)
    o_ref[0] = (e + emb_ref[0]).astype(o_ref.dtype)


def patch_branch(patches_cf, emb, pool_p, gauss_p, params, hp, wp):
    bs, npc3, hw = patches_cf.shape
    NP = npc3 // 3
    Sp = hp * wp
    hid, C = HIDDEN, C_BACK

    w_stem = params["backbone"]["w"].T                     # (C, 3)
    b_stem = params["backbone"]["b"].reshape(C, 1)
    # SimplifiedCSFF (1x1 conv) and the EPF linear are both linear -> fold once
    w_se = params["simplified_csff"]["w"] @ params["epf"]["w"]            # (C, hid)
    b_se = (params["simplified_csff"]["b"] @ params["epf"]["w"]
            + params["epf"]["b"]).reshape(1, hid)

    shared = lambda shape: pl.BlockSpec(shape, lambda b: (0,) * len(shape))
    return pl.pallas_call(
        functools.partial(_patch_kernel, num_patches=NP, pooled_hw=Sp),
        out_shape=jax.ShapeDtypeStruct((bs, NP, hid), jnp.float32),
        grid=(bs,),
        in_specs=[
            pl.BlockSpec((1, npc3, hw), lambda b: (b, 0, 0)),
            pl.BlockSpec((1, NP, hid), lambda b: (b, 0, 0)),
            shared((hw, Sp)), shared((Sp, Sp)),
            shared((C, 3)), shared((C, 1)),
            shared((C, hid)), shared((1, hid)),
        ],
        out_specs=pl.BlockSpec((1, NP, hid), lambda b: (b, 0, 0)),
        scratch_shapes=[pltpu.VMEM((NP, C), jnp.float32)],
        compiler_params=pltpu.CompilerParams(dimension_semantics=("parallel",)),
    )(patches_cf, emb, pool_p, gauss_p, w_stem, b_stem, w_se, b_se)


# ----------------------------------------------------------------------------
# CACModel forward
# ----------------------------------------------------------------------------
def cac_forward(samples, patches_in, is_train, params):
    scale_embedding = patches_in["scale_embedding"]
    patches = patches_in["patches"]
    bs, _, H, W = samples.shape
    NP = patches.shape[1]
    hp_in, wp_in = patches.shape[3], patches.shape[4]
    Hq, Wq = H // POOL, W // POOL
    hp, wp = hp_in // POOL, wp_in // POOL

    # constant linear spatial operators (pool / blur); data-independent
    pool_q = avgpool_matrix(H, W)
    gauss_q = gauss3x3_matrix(Hq, Wq)
    pool_p = avgpool_matrix(hp_in, wp_in)
    gauss_p = gauss3x3_matrix(hp, wp)

    # --- patch branch (all NP patches of a batch element per grid step) ---
    emb = params["epf"]["scale_table"][scale_embedding]            # (bs, NP, hid)
    patches_cf = patches.reshape(bs, NP * 3, hp_in * wp_in)        # free NCHW reshape
    patch_feature = patch_branch(patches_cf, emb, pool_p, gauss_p, params, hp, wp)

    # --- fused query branch + refiner + matcher + counter ---
    samples_cf = samples.reshape(bs, 3, H * W)                     # free NCHW reshape
    outs = query_match(samples_cf, patch_feature, pool_q, gauss_q, params,
                       Hq, Wq, with_corr=is_train)
    if not is_train:
        return outs.reshape(bs, 1, Hq, Wq)
    dens, corr = outs
    return {"corr_map": corr.reshape(bs, NP, Hq, Wq),
            "density_map": dens.reshape(bs, 1, Hq, Wq)}


# ----------------------------------------------------------------------------
# Deterministic parameter init
# ----------------------------------------------------------------------------
def init_params(key):
    ks = jax.random.split(key, 10)
    w = lambda k, s: jax.random.normal(k, s, jnp.float32) * 0.05
    z = lambda n: jnp.zeros((n,), jnp.float32)
    return {
        "backbone": {"w": w(ks[0], (3, C_BACK)), "b": z(C_BACK)},
        "csff_query": {"w1": w(ks[1], (C_BACK, C_BACK)), "b1": z(C_BACK),
                       "w2": w(ks[2], (C_BACK, C_BACK)), "b2": z(C_BACK)},
        "simplified_csff": {"w": w(ks[3], (C_BACK, C_BACK)), "b": z(C_BACK)},
        "input_proj": {"w": w(ks[4], (C_BACK, HIDDEN)), "b": z(HIDDEN)},
        "epf": {"w": w(ks[5], (C_BACK, HIDDEN)), "b": z(HIDDEN),
                "scale_table": w(ks[6], (NUM_SCALES, HIDDEN))},
        "refiner": {"w": w(ks[7], (HIDDEN, HIDDEN)), "b": z(HIDDEN)},
        "counter": {"w": w(ks[8], (HIDDEN, 1)), "b": z(1)},
    }


if __name__ == "__main__":
    key = jax.random.PRNGKey(0)
    k = jax.random.split(key, 4)

    BS, NP = 2, 3
    samples = jax.random.normal(k[0], (BS, 3, 32, 32), jnp.float32)
    patches = jax.random.normal(k[1], (BS, NP, 3, 16, 16), jnp.float32)
    scale_embedding = jax.random.randint(k[2], (BS, NP), 0, NUM_SCALES)
    params = init_params(k[3])

    patches_in = {"scale_embedding": scale_embedding, "patches": patches}

    # training path: dict of corr_map + density_map
    out_train = cac_forward(samples, patches_in, True, params)
    jax.block_until_ready(out_train["density_map"])
    jax.block_until_ready(out_train["corr_map"])
    assert out_train["density_map"].shape == (BS, 1, 8, 8)
    assert out_train["corr_map"].shape == (BS, NP, 8, 8)
    assert bool(jnp.all(jnp.isfinite(out_train["density_map"])))
    assert bool(jnp.all(jnp.isfinite(out_train["corr_map"])))

    # eval path: density map only (corr never written to HBM)
    out_eval = cac_forward(samples, patches_in, False, params)
    jax.block_until_ready(out_eval)
    assert out_eval.shape == (BS, 1, 8, 8)
    assert bool(jnp.all(jnp.isfinite(out_eval)))

    print("KERNEL_OK")
</pallas_src>

<mosaic_0001>
module attributes {stable_mosaic.version = 11 : i64} {
  func.func @_patch_kernel(%arg0: i32, %arg1: memref<1x9x256xf32, #tpu.memory_space<vmem>>, %arg2: memref<1x3x16xf32, #tpu.memory_space<vmem>>, %arg3: memref<256x16xf32, #tpu.memory_space<vmem>>, %arg4: memref<16x16xf32, #tpu.memory_space<vmem>>, %arg5: memref<32x3xf32, #tpu.memory_space<vmem>>, %arg6: memref<32x1xf32, #tpu.memory_space<vmem>>, %arg7: memref<32x16xf32, #tpu.memory_space<vmem>>, %arg8: memref<1x16xf32, #tpu.memory_space<vmem>>, %arg9: memref<1x3x16xf32, #tpu.memory_space<vmem>>, %arg10: memref<3x32xf32, #tpu.memory_space<vmem>>) attributes {dimension_semantics = [#tpu.dimension_semantics<parallel>], iteration_bounds = array<i64: 2>, scalar_prefetch = 0 : i64, scratch_operands = 1 : i64, tpu.core_type = #tpu.core_type<tc>, window_params = [{transform_indices = @transform_0, window_bounds = array<i64: 1, 9, 256>}, {transform_indices = @transform_1, window_bounds = array<i64: 1, 3, 16>}, {pipeline_mode = #tpu.pipeline_mode<synchronous>, transform_indices = @transform_2, window_bounds = array<i64: 256, 16>}, {pipeline_mode = #tpu.pipeline_mode<synchronous>, transform_indices = @transform_3, window_bounds = array<i64: 16, 16>}, {pipeline_mode = #tpu.pipeline_mode<synchronous>, transform_indices = @transform_4, window_bounds = array<i64: 32, 3>}, {pipeline_mode = #tpu.pipeline_mode<synchronous>, transform_indices = @transform_5, window_bounds = array<i64: 32, 1>}, {pipeline_mode = #tpu.pipeline_mode<synchronous>, transform_indices = @transform_6, window_bounds = array<i64: 32, 16>}, {pipeline_mode = #tpu.pipeline_mode<synchronous>, transform_indices = @transform_7, window_bounds = array<i64: 1, 16>}, {transform_indices = @transform_8, window_bounds = array<i64: 1, 3, 16>}]} {
    %c0 = arith.constant 0 : index
    %c0_0 = arith.constant 0 : index
    %c0_1 = arith.constant 0 : index
    %0 = vector.load %arg1[%c0, %c0_0, %c0_1] : memref<1x9x256xf32, #tpu.memory_space<vmem>>, vector<1x9x256xf32>
    %1 = vector.shape_cast %0 : vector<1x9x256xf32> to vector<9x256xf32>
    %c0_2 = arith.constant 0 : index
    %c0_3 = arith.constant 0 : index
    %2 = vector.load %arg5[%c0_2, %c0_3] : memref<32x3xf32, #tpu.memory_space<vmem>>, vector<32x3xf32>
    %c0_4 = arith.constant 0 : index
    %c0_5 = arith.constant 0 : index
    %3 = vector.load %arg6[%c0_4, %c0_5] : memref<32x1xf32, #tpu.memory_space<vmem>>, vector<32x1xf32>
    %cst = arith.constant 6.250000e-02 : f32
    %4 = vector.broadcast %cst : f32 to vector<1x16xf32>
    %5 = vector.extract_strided_slice %1 {offsets = [0, 0], sizes = [3, 256], strides = [1, 1]} : vector<9x256xf32> to vector<3x256xf32>
    %6 = vector.extract_strided_slice %2 {offsets = [0, 0], sizes = [32, 1], strides = [1, 1]} : vector<32x3xf32> to vector<32x1xf32>
    %7 = vector.extract_strided_slice %5 {offsets = [0, 0], sizes = [1, 256], strides = [1, 1]} : vector<3x256xf32> to vector<1x256xf32>
    %8 = vector.broadcast %6 : vector<32x1xf32> to vector<32x256xf32>
    %9 = vector.broadcast %7 : vector<1x256xf32> to vector<32x256xf32>
    %10 = arith.mulf %8, %9 : vector<32x256xf32>
    %11 = vector.extract_strided_slice %2 {offsets = [0, 1], sizes = [32, 1], strides = [1, 1]} : vector<32x3xf32> to vector<32x1xf32>
    %12 = vector.extract_strided_slice %5 {offsets = [1, 0], sizes = [1, 256], strides = [1, 1]} : vector<3x256xf32> to vector<1x256xf32>
    %13 = vector.broadcast %11 : vector<32x1xf32> to vector<32x256xf32>
    %14 = vector.broadcast %12 : vector<1x256xf32> to vector<32x256xf32>
    %15 = arith.mulf %13, %14 : vector<32x256xf32>
    %16 = arith.addf %10, %15 : vector<32x256xf32>
    %17 = vector.extract_strided_slice %2 {offsets = [0, 2], sizes = [32, 1], strides = [1, 1]} : vector<32x3xf32> to vector<32x1xf32>
    %18 = vector.extract_strided_slice %5 {offsets = [2, 0], sizes = [1, 256], strides = [1, 1]} : vector<3x256xf32> to vector<1x256xf32>
    %19 = vector.broadcast %17 : vector<32x1xf32> to vector<32x256xf32>
    %20 = vector.broadcast %18 : vector<1x256xf32> to vector<32x256xf32>
    %21 = arith.mulf %19, %20 : vector<32x256xf32>
    %22 = arith.addf %16, %21 : vector<32x256xf32>
    %23 = vector.broadcast %3 : vector<32x1xf32> to vector<32x256xf32>
    %24 = arith.addf %22, %23 : vector<32x256xf32>
    %cst_6 = arith.constant 0.000000e+00 : f32
    %25 = vector.broadcast %cst_6 : f32 to vector<32x256xf32>
    %26 = arith.maximumf %24, %25 : vector<32x256xf32>
    %c0_7 = arith.constant 0 : index
    %c0_8 = arith.constant 0 : index
    %27 = vector.load %arg3[%c0_7, %c0_8] : memref<256x16xf32, #tpu.memory_space<vmem>>, vector<256x16xf32>
    %cst_9 = arith.constant dense<0.000000e+00> : vector<32x16xf32>
    %28 = tpu.matmul %26, %27, %cst_9 {dimension_numbers = #tpu.dot_dimension_numbers<[1], [0], [0], [1], [0, 0, 1, 1], [], []>} : vector<32x256xf32>, vector<256x16xf32>, vector<32x16xf32> -> vector<32x16xf32>
    %c0_10 = arith.constant 0 : index
    %c0_11 = arith.constant 0 : index
    %29 = vector.load %arg4[%c0_10, %c0_11] : memref<16x16xf32, #tpu.memory_space<vmem>>, vector<16x16xf32>
    %cst_12 = arith.constant dense<0.000000e+00> : vector<32x16xf32>
    %30 = tpu.matmul %28, %29, %cst_12 {dimension_numbers = #tpu.dot_dimension_numbers<[1], [0], [0], [1], [0, 0, 1, 1], [], []>} : vector<32x16xf32>, vector<16x16xf32>, vector<32x16xf32> -> vector<32x16xf32>
    %31 = arith.subf %28, %30 : vector<32x16xf32>
    %32 = arith.negf %31 : vector<32x16xf32>
    %33 = math.exp %32 : vector<32x16xf32>
    %cst_13 = arith.constant 1.000000e+00 : f32
    %34 = vector.broadcast %cst_13 : f32 to vector<32x16xf32>
    %35 = arith.addf %34, %33 : vector<32x16xf32>
    %36 = arith.divf %34, %35 : vector<32x16xf32>
    %37 = arith.mulf %28, %36 : vector<32x16xf32>
    %38 = arith.addf %28, %37 : vector<32x16xf32>
    %cst_14 = arith.constant dense<0.000000e+00> : vector<1x32xf32>
    %39 = tpu.matmul %4, %38, %cst_14 {dimension_numbers = #tpu.dot_dimension_numbers<[1], [1], [0], [0], [0, 0, 1, 0], [], []>} : vector<1x16xf32>, vector<32x16xf32>, vector<1x32xf32> -> vector<1x32xf32>
    %c0_15 = arith.constant 0 : index
    %c0_16 = arith.constant 0 : index
    %40 = vector.load %arg10[%c0_15, %c0_16] : memref<3x32xf32, #tpu.memory_space<vmem>>, vector<1x32xf32>
    tpu.vector_store %arg10[%c0_15, %c0_16], %39 {strides = array<i32>} : memref<3x32xf32, #tpu.memory_space<vmem>>, vector<1x32xf32>,
    %41 = vector.extract_strided_slice %1 {offsets = [3, 0], sizes = [3, 256], strides = [1, 1]} : vector<9x256xf32> to vector<3x256xf32>
    %42 = vector.extract_strided_slice %2 {offsets = [0, 0], sizes = [32, 1], strides = [1, 1]} : vector<32x3xf32> to vector<32x1xf32>
    %43 = vector.extract_strided_slice %41 {offsets = [0, 0], sizes = [1, 256], strides = [1, 1]} : vector<3x256xf32> to vector<1x256xf32>
    %44 = vector.broadcast %42 : vector<32x1xf32> to vector<32x256xf32>
    %45 = vector.broadcast %43 : vector<1x256xf32> to vector<32x256xf32>
    %46 = arith.mulf %44, %45 : vector<32x256xf32>
    %47 = vector.extract_strided_slice %2 {offsets = [0, 1], sizes = [32, 1], strides = [1, 1]} : vector<32x3xf32> to vector<32x1xf32>
    %48 = vector.extract_strided_slice %41 {offsets = [1, 0], sizes = [1, 256], strides = [1, 1]} : vector<3x256xf32> to vector<1x256xf32>
    %49 = vector.broadcast %47 : vector<32x1xf32> to vector<32x256xf32>
    %50 = vector.broadcast %48 : vector<1x256xf32> to vector<32x256xf32>
    %51 = arith.mulf %49, %50 : vector<32x256xf32>
    %52 = arith.addf %46, %51 : vector<32x256xf32>
    %53 = vector.extract_strided_slice %2 {offsets = [0, 2], sizes = [32, 1], strides = [1, 1]} : vector<32x3xf32> to vector<32x1xf32>
    %54 = vector.extract_strided_slice %41 {offsets = [2, 0], sizes = [1, 256], strides = [1, 1]} : vector<3x256xf32> to vector<1x256xf32>
    %55 = vector.broadcast %53 : vector<32x1xf32> to vector<32x256xf32>
    %56 = vector.broadcast %54 : vector<1x256xf32> to vector<32x256xf32>
    %57 = arith.mulf %55, %56 : vector<32x256xf32>
    %58 = arith.addf %52, %57 : vector<32x256xf32>
    %59 = vector.broadcast %3 : vector<32x1xf32> to vector<32x256xf32>
    %60 = arith.addf %58, %59 : vector<32x256xf32>
    %cst_17 = arith.constant 0.000000e+00 : f32
    %61 = vector.broadcast %cst_17 : f32 to vector<32x256xf32>
    %62 = arith.maximumf %60, %61 : vector<32x256xf32>
    %c0_18 = arith.constant 0 : index
    %c0_19 = arith.constant 0 : index
    %63 = vector.load %arg3[%c0_18, %c0_19] : memref<256x16xf32, #tpu.memory_space<vmem>>, vector<256x16xf32>
    %cst_20 = arith.constant dense<0.000000e+00> : vector<32x16xf32>
    %64 = tpu.matmul %62, %63, %cst_20 {dimension_numbers = #tpu.dot_dimension_numbers<[1], [0], [0], [1], [0, 0, 1, 1], [], []>} : vector<32x256xf32>, vector<256x16xf32>, vector<32x16xf32> -> vector<32x16xf32>
    %c0_21 = arith.constant 0 : index
    %c0_22 = arith.constant 0 : index
    %65 = vector.load %arg4[%c0_21, %c0_22] : memref<16x16xf32, #tpu.memory_space<vmem>>, vector<16x16xf32>
    %cst_23 = arith.constant dense<0.000000e+00> : vector<32x16xf32>
    %66 = tpu.matmul %64, %65, %cst_23 {dimension_numbers = #tpu.dot_dimension_numbers<[1], [0], [0], [1], [0, 0, 1, 1], [], []>} : vector<32x16xf32>, vector<16x16xf32>, vector<32x16xf32> -> vector<32x16xf32>
    %67 = arith.subf %64, %66 : vector<32x16xf32>
    %68 = arith.negf %67 : vector<32x16xf32>
    %69 = math.exp %68 : vector<32x16xf32>
    %cst_24 = arith.constant 1.000000e+00 : f32
    %70 = vector.broadcast %cst_24 : f32 to vector<32x16xf32>
    %71 = arith.addf %70, %69 : vector<32x16xf32>
    %72 = arith.divf %70, %71 : vector<32x16xf32>
    %73 = arith.mulf %64, %72 : vector<32x16xf32>
    %74 = arith.addf %64, %73 : vector<32x16xf32>
    %cst_25 = arith.constant dense<0.000000e+00> : vector<1x32xf32>
    %75 = tpu.matmul %4, %74, %cst_25 {dimension_numbers = #tpu.dot_dimension_numbers<[1], [1], [0], [0], [0, 0, 1, 0], [], []>} : vector<1x16xf32>, vector<32x16xf32>, vector<1x32xf32> -> vector<1x32xf32>
    %c1 = arith.constant 1 : index
    %c0_26 = arith.constant 0 : index
    %76 = vector.load %arg10[%c1, %c0_26] : memref<3x32xf32, #tpu.memory_space<vmem>>, vector<1x32xf32>
    tpu.vector_store %arg10[%c1, %c0_26], %75 {strides = array<i32>} : memref<3x32xf32, #tpu.memory_space<vmem>>, vector<1x32xf32>,
    %77 = vector.extract_strided_slice %1 {offsets = [6, 0], sizes = [3, 256], strides = [1, 1]} : vector<9x256xf32> to vector<3x256xf32>
    %78 = vector.extract_strided_slice %2 {offsets = [0, 0], sizes = [32, 1], strides = [1, 1]} : vector<32x3xf32> to vector<32x1xf32>
    %79 = vector.extract_strided_slice %77 {offsets = [0, 0], sizes = [1, 256], strides = [1, 1]} : vector<3x256xf32> to vector<1x256xf32>
    %80 = vector.broadcast %78 : vector<32x1xf32> to vector<32x256xf32>
    %81 = vector.broadcast %79 : vector<1x256xf32> to vector<32x256xf32>
    %82 = arith.mulf %80, %81 : vector<32x256xf32>
    %83 = vector.extract_strided_slice %2 {offsets = [0, 1], sizes = [32, 1], strides = [1, 1]} : vector<32x3xf32> to vector<32x1xf32>
    %84 = vector.extract_strided_slice %77 {offsets = [1, 0], sizes = [1, 256], strides = [1, 1]} : vector<3x256xf32> to vector<1x256xf32>
    %85 = vector.broadcast %83 : vector<32x1xf32> to vector<32x256xf32>
    %86 = vector.broadcast %84 : vector<1x256xf32> to vector<32x256xf32>
    %87 = arith.mulf %85, %86 : vector<32x256xf32>
    %88 = arith.addf %82, %87 : vector<32x256xf32>
    %89 = vector.extract_strided_slice %2 {offsets = [0, 2], sizes = [32, 1], strides = [1, 1]} : vector<32x3xf32> to vector<32x1xf32>
    %90 = vector.extract_strided_slice %77 {offsets = [2, 0], sizes = [1, 256], strides = [1, 1]} : vector<3x256xf32> to vector<1x256xf32>
    %91 = vector.broadcast %89 : vector<32x1xf32> to vector<32x256xf32>
    %92 = vector.broadcast %90 : vector<1x256xf32> to vector<32x256xf32>
    %93 = arith.mulf %91, %92 : vector<32x256xf32>
    %94 = arith.addf %88, %93 : vector<32x256xf32>
    %95 = vector.broadcast %3 : vector<32x1xf32> to vector<32x256xf32>
    %96 = arith.addf %94, %95 : vector<32x256xf32>
    %cst_27 = arith.constant 0.000000e+00 : f32
    %97 = vector.broadcast %cst_27 : f32 to vector<32x256xf32>
    %98 = arith.maximumf %96, %97 : vector<32x256xf32>
    %c0_28 = arith.constant 0 : index
    %c0_29 = arith.constant 0 : index
    %99 = vector.load %arg3[%c0_28, %c0_29] : memref<256x16xf32, #tpu.memory_space<vmem>>, vector<256x16xf32>
    %cst_30 = arith.constant dense<0.000000e+00> : vector<32x16xf32>
    %100 = tpu.matmul %98, %99, %cst_30 {dimension_numbers = #tpu.dot_dimension_numbers<[1], [0], [0], [1], [0, 0, 1, 1], [], []>} : vector<32x256xf32>, vector<256x16xf32>, vector<32x16xf32> -> vector<32x16xf32>
    %c0_31 = arith.constant 0 : index
    %c0_32 = arith.constant 0 : index
    %101 = vector.load %arg4[%c0_31, %c0_32] : memref<16x16xf32, #tpu.memory_space<vmem>>, vector<16x16xf32>
    %cst_33 = arith.constant dense<0.000000e+00> : vector<32x16xf32>
    %102 = tpu.matmul %100, %101, %cst_33 {dimension_numbers = #tpu.dot_dimension_numbers<[1], [0], [0], [1], [0, 0, 1, 1], [], []>} : vector<32x16xf32>, vector<16x16xf32>, vector<32x16xf32> -> vector<32x16xf32>
    %103 = arith.subf %100, %102 : vector<32x16xf32>
    %104 = arith.negf %103 : vector<32x16xf32>
    %105 = math.exp %104 : vector<32x16xf32>
    %cst_34 = arith.constant 1.000000e+00 : f32
    %106 = vector.broadcast %cst_34 : f32 to vector<32x16xf32>
    %107 = arith.addf %106, %105 : vector<32x16xf32>
    %108 = arith.divf %106, %107 : vector<32x16xf32>
    %109 = arith.mulf %100, %108 : vector<32x16xf32>
    %110 = arith.addf %100, %109 : vector<32x16xf32>
    %cst_35 = arith.constant dense<0.000000e+00> : vector<1x32xf32>
    %111 = tpu.matmul %4, %110, %cst_35 {dimension_numbers = #tpu.dot_dimension_numbers<[1], [1], [0], [0], [0, 0, 1, 0], [], []>} : vector<1x16xf32>, vector<32x16xf32>, vector<1x32xf32> -> vector<1x32xf32>
    %c2 = arith.constant 2 : index
    %c0_36 = arith.constant 0 : index
    %112 = vector.load %arg10[%c2, %c0_36] : memref<3x32xf32, #tpu.memory_space<vmem>>, vector<1x32xf32>
    tpu.vector_store %arg10[%c2, %c0_36], %111 {strides = array<i32>} : memref<3x32xf32, #tpu.memory_space<vmem>>, vector<1x32xf32>,
    %c0_37 = arith.constant 0 : index
    %c0_38 = arith.constant 0 : index
    %113 = vector.load %arg10[%c0_37, %c0_38] : memref<3x32xf32, #tpu.memory_space<vmem>>, vector<3x32xf32>
    %c0_39 = arith.constant 0 : index
    %c0_40 = arith.constant 0 : index
    %114 = vector.load %arg7[%c0_39, %c0_40] : memref<32x16xf32, #tpu.memory_space<vmem>>, vector<32x16xf32>
    %cst_41 = arith.constant dense<0.000000e+00> : vector<3x16xf32>
    %115 = tpu.matmul %113, %114, %cst_41 {dimension_numbers = #tpu.dot_dimension_numbers<[1], [0], [0], [1], [0, 0, 1, 1], [], []>} : vector<3x32xf32>, vector<32x16xf32>, vector<3x16xf32> -> vector<3x16xf32>
    %c0_42 = arith.constant 0 : index
    %c0_43 = arith.constant 0 : index
    %116 = vector.load %arg8[%c0_42, %c0_43] : memref<1x16xf32, #tpu.memory_space<vmem>>, vector<1x16xf32>
    %117 = vector.broadcast %116 : vector<1x16xf32> to vector<3x16xf32>
    %118 = arith.addf %115, %117 : vector<3x16xf32>
    %c0_44 = arith.constant 0 : index
    %c0_45 = arith.constant 0 : index
    %c0_46 = arith.constant 0 : index
    %119 = vector.load %arg2[%c0_44, %c0_45, %c0_46] : memref<1x3x16xf32, #tpu.memory_space<vmem>>, vector<1x3x16xf32>
    %120 = vector.shape_cast %119 : vector<1x3x16xf32> to vector<3x16xf32>
    %121 = arith.addf %118, %120 : vector<3x16xf32>
    %c0_47 = arith.constant 0 : index
    %c0_48 = arith.constant 0 : index
    %c0_49 = arith.constant 0 : index
    %122 = vector.load %arg9[%c0_47, %c0_48, %c0_49] : memref<1x3x16xf32, #tpu.memory_space<vmem>>, vector<1x3x16xf32>
    %123 = vector.shape_cast %122 : vector<1x3x16xf32> to vector<3x16xf32>
    %124 = vector.shape_cast %121 : vector<3x16xf32> to vector<1x3x16xf32>
    tpu.vector_store %arg9[%c0_47, %c0_48, %c0_49], %124 {strides = array<i32>} : memref<1x3x16xf32, #tpu.memory_space<vmem>>, vector<1x3x16xf32>,
    return
  }
  func.func @transform_0(%arg0: i32) -> (i32, i32, i32) {
    %c0_i32 = arith.constant 0 : i32
    %c0_i32_0 = arith.constant 0 : i32
    %c0_i32_1 = arith.constant 0 : i32
    return %arg0, %c0_i32, %c0_i32_0 : i32, i32, i32
  }
  func.func @transform_1(%arg0: i32) -> (i32, i32, i32) {
    %c0_i32 = arith.constant 0 : i32
    %c0_i32_0 = arith.constant 0 : i32
    %c0_i32_1 = arith.constant 0 : i32
    return %arg0, %c0_i32, %c0_i32_0 : i32, i32, i32
  }
  func.func @transform_2(%arg0: i32) -> (i32, i32) {
    %c0_i32 = arith.constant 0 : i32
    %c0_i32_0 = arith.constant 0 : i32
    %c0_i32_1 = arith.constant 0 : i32
    return %c0_i32, %c0_i32_0 : i32, i32
  }
  func.func @transform_3(%arg0: i32) -> (i32, i32) {
    %c0_i32 = arith.constant 0 : i32
    %c0_i32_0 = arith.constant 0 : i32
    %c0_i32_1 = arith.constant 0 : i32
    return %c0_i32, %c0_i32_0 : i32, i32
  }
  func.func @transform_4(%arg0: i32) -> (i32, i32) {
    %c0_i32 = arith.constant 0 : i32
    %c0_i32_0 = arith.constant 0 : i32
    %c0_i32_1 = arith.constant 0 : i32
    return %c0_i32, %c0_i32_0 : i32, i32
  }
  func.func @transform_5(%arg0: i32) -> (i32, i32) {
    %c0_i32 = arith.constant 0 : i32
    %c0_i32_0 = arith.constant 0 : i32
    %c0_i32_1 = arith.constant 0 : i32
    return %c0_i32, %c0_i32_0 : i32, i32
  }
  func.func @transform_6(%arg0: i32) -> (i32, i32) {
    %c0_i32 = arith.constant 0 : i32
    %c0_i32_0 = arith.constant 0 : i32
    %c0_i32_1 = arith.constant 0 : i32
    return %c0_i32, %c0_i32_0 : i32, i32
  }
  func.func @transform_7(%arg0: i32) -> (i32, i32) {
    %c0_i32 = arith.constant 0 : i32
    %c0_i32_0 = arith.constant 0 : i32
    %c0_i32_1 = arith.constant 0 : i32
    return %c0_i32, %c0_i32_0 : i32, i32
  }
  func.func @transform_8(%arg0: i32) -> (i32, i32, i32) {
    %c0_i32 = arith.constant 0 : i32
    %c0_i32_0 = arith.constant 0 : i32
    %c0_i32_1 = arith.constant 0 : i32
    return %arg0, %c0_i32, %c0_i32_0 : i32, i32, i32
  }
}

</mosaic_0001>

<bundles_post_ra>
// kernel: tpu_custom_call.1
= control target key start
LH: loop header
LB: loop body
LE: loop exit
PB: predicated region body
PF: predicated region fallthrough
CT: control target
= control target key end

     0   :  { %s2383_s27 = smov 0   ;;  %s2989_s0 = inlined_call_operand.vmem [shape: f32[2,9,256], index: 0, kind: input, shape index: {}]   ;;  %s2990_s1 = inlined_call_operand.vmem [shape: f32[2,3,16], index: 1, kind: input, shape index: {}]   ;;  %s2991_s2 = inlined_call_operand.vmem [shape: f32[256,16], index: 2, kind: input, shape index: {}]   ;;  %s2992_s3 = inlined_call_operand.vmem [shape: f32[16,16], index: 3, kind: input, shape index: {}]   ;;  %s2993_s4 = inlined_call_operand.vmem [shape: f32[32,3], index: 4, kind: input, shape index: {}]   ;;  %s2994_s5 = inlined_call_operand.vmem [shape: f32[32,1], index: 5, kind: input, shape index: {}]   ;;  %s2995_s6 = inlined_call_operand.vmem [shape: f32[32,16], index: 6, kind: input, shape index: {}]   ;;  %s2996_s7 = inlined_call_operand.vmem [shape: f32[1,16], index: 7, kind: input, shape index: {}]   ;;  %s2997_s8 = inlined_call_operand.vmem [shape: f32[2,3,16], index: 8, kind: output, shape index: {}]  }
   0x1 LB: > { %s1810_s28 = sadd.s32 4294967295, %s2329_s27   ;;  %p1814_p0 = scmp.ge.s32.totalorder %s2329_s27, 1  ;;  %s2329_s27 = sphi %s2383_s27, %s18_s27  }
   0x2   : > { %p271_p1 = scmp.lt.s32.totalorder %s2329_s27, 3 }
   0x4   : > { %p272_p2 = pnand %p1814_p0, %p271_p1 }
   0x6   : > { %275 = sbr.rel (%p272_p2) target bundleno = 1877 (0x755), region = 52 }
   0xd   : > { %v325_v0 = vld [vmem:[%s2993_s4] sm:$0xff]  ;;  %v353_v1 = vlaneseq  ;;  %v2331_v2 = vmov 2   ;;  %v2332_v3 = vmov 0   ;;  %p308_p3 = scmp.lt.s32.totalorder %s1810_s28, 1  ;;  %v502_v6 = vld [vmem:[%s2991_s2 + $0x88] sm:$0xff]  ;;  %v503_v11 = vld [vmem:[%s2991_s2 + $0x90] sm:$0xff] }
   0xe   : > { %2263 = vset.pattern.permute.xlu1 %v2331_v2  ;;  %2262 = vset.pattern.permute.xlu0 %v2332_v3  ;;  %v501_v4 = vld [vmem:[%s2991_s2 + $0x80] sm:$0xff]  ;;  %v486_v8 = vld [vmem:[%s2991_s2 + $0x8] sm:$0xff]  ;;  %v504_v12 = vld [vmem:[%s2991_s2 + $0x98] sm:$0xff]  ;;  %v2333_v33 = vmov 1   ;;  %vm604_vm0 = vcmask 130048   ;;  %vm2335_vm1 = vmmov 0  }
   0xf   : > { %410 = vperm.xlu1 %2263, %v325_v0   ;;  %335 = vperm.xlu0 %2262, %v325_v0   ;;  %v2399_v5 = vshrl.u32 %v353_v1, 7  ;;  %v485_v7 = vld [vmem:[%s2991_s2] sm:$0xff]  ;;  %s3073_s28 = smov (!%p308_p3, %s1810_s28), 1  ;;  %v326_v9 = vld [vmem:[%s2993_s4 + $0x8] sm:$0xff]  ;;  %v2415_v10 = vpack.c.bf16 %v502_v6, %v501_v4  ;;  %v2431_v17 = vpack.c.bf16 %v504_v12, %v503_v11  ;;  %v487_v18 = vld [vmem:[%s2991_s2 + $0x10] sm:$0xff]  ;;  %vm823_vm3 = vcmask 253952  }
  0x10   : > { %v2425_v15 = vpack.c.bf16 %v486_v8, %v485_v7  ;;  %s1864_s23 = sshll.u32 %s3073_s28, 5  ;;  %v488_v19 = vld [vmem:[%s2991_s2 + $0x18] sm:$0xff]  ;;  %v505_v20 = vld [vmem:[%s2991_s2 + $0xa0] sm:$0xff]  ;;  %v506_v21 = vld [vmem:[%s2991_s2 + $0xa8] sm:$0xff]  ;;  %vm1667_vm4 = vcmask 261120   ;;  %s1817_s25 = sshll.u32 %s3073_s28, 2 }
  0x11   : > { %3034 = vst [vmem:[#allocation3_spill] sm:$0xff] %v2415_v10  ;;  %v867_v13 = vsub.s32 5, %v2399_v5  ;;  %v827_v14 = vsub.s32 3, %v2399_v5  ;;  %v1242_v16 = vsub.s32 6, %v2399_v5  ;;  %3036 = vst [vmem:[#allocation5_spill] sm:$0xff] %v2431_v17  ;;  %s2442_s10 = scalar_lea.vmem %s2989_s0, %s1864_s23  ;;  %2110 = vmatprep.subr.bf16.mxu0 %v2415_v10  ;;  %v843_v26 = vsub.s32 4, %v2399_v5  ;;  %s316_s30 = scalar_lea.vmem %s2990_s1, %s1817_s25 }
  0x12   : > { %3035 = vst [vmem:[#allocation4_spill] sm:$0xff] %v2425_v15  ;;  %v2451_v22 = vld [vmem:[%s2442_s10] sm:$0xff]  ;;  %2112 = vmatpush3.bf16.msra.mxu0 %v2425_v15  ;;  %v2465_v27 = vpack.c.bf16 %v488_v19, %v487_v18  ;;  %v1258_v28 = vsub.s32 7, %v2399_v5  ;;  %v2469_v29 = vpack.c.bf16 %v506_v21, %v505_v20  ;;  %v490_v31 = vld [vmem:[%s2991_s2 + $0x28] sm:$0xff]  ;;  %v507_v35 = vld [vmem:[%s2991_s2 + $0xb0] sm:$0xff]  ;;  %vm1743_vm5 = vcmask 124928  }
  0x13   : > { %2264 = vset.pattern.permute.xlu1 %v2332_v3  ;;  %2266 = vset.pattern.permute.xlu0 %v2331_v2  ;;  %v2455_v23 = vrot.slane %v2451_v22, %v867_v13  ;;  %v2458_v24 = vrot.slane %v2451_v22, %v827_v14  ;;  %v2461_v25 = vrot.slane %v2451_v22, %v1242_v16  ;;  %v489_v30 = vld [vmem:[%s2991_s2 + $0x20] sm:$0xff]  ;;  %v2483_v34 = vld [vmem:[%s2442_s10 + $0x8] sm:$0xff]  ;;  %v508_v36 = vld [vmem:[%s2991_s2 + $0xb8] sm:$0xff] }
  0x14   : > { %340 = vperm.xlu1 %2264, %v326_v9   ;;  %414 = vperm.xlu0 %2266, %v326_v9   ;;  %3038 = vst [vmem:[#allocation7_spill] sm:$0xff] %v2465_v27  ;;  %3039 = vst [vmem:[#allocation8_spill] sm:$0xff] %v2469_v29  ;;  %v2478_v32 = vrot.slane %v2451_v22, %v843_v26  ;;  %v2492_v37 = vrot.slane %v2451_v22, %v1258_v28  ;;  %v327_v38 = vld [vmem:[%s2993_s4 + $0x10] sm:$0xff]  ;;  %v329_v41 = vld [vmem:[%s2994_s5] sm:$0xff] }
  0x15   : > { %3037 = vst [vmem:[#allocation6_spill] sm:$0xff] %v2461_v25  ;;  %2114 = vmatprep.subr.bf16.mxu0 %v2431_v17  ;;  %v2498_v39 = vpack.c.bf16 %v490_v31, %v489_v30  ;;  %v2501_v40 = vrot.slane %v2483_v34, %v827_v14  ;;  %v2507_v42 = vpack.c.bf16 %v508_v36, %v507_v35  ;;  %v491_v46 = vld [vmem:[%s2991_s2 + $0x30] sm:$0xff]  ;;  %v492_v47 = vld [vmem:[%s2991_s2 + $0x38] sm:$0xff]  ;;  %v509_v48 = vld [vmem:[%s2991_s2 + $0xc0] sm:$0xff]  ;;  %v427_v30 = vsub.s32 2, %v2399_v5 }
  0x16   : > { %2116 = vmatpush3.bf16.msra.mxu0 %v2465_v27  ;;  %v2510_v43 = vrot.slane %v2483_v34, %v843_v26  ;;  %v2513_v44 = vrot.slane %v2483_v34, %v867_v13  ;;  %v2516_v45 = vrot.slane %v2483_v34, %v1242_v16  ;;  %v510_v49 = vld [vmem:[%s2991_s2 + $0xc8] sm:$0xff]  ;;  %v328_v50 = vld [vmem:[%s2993_s4 + $0x18] sm:$0xff]  ;;  %v2536_v51 = vpack.c.bf16 %v492_v47, %v491_v46  ;;  %v493_v54 = vld [vmem:[%s2991_s2 + $0x40] sm:$0xff] }
  0x17   : > { %3040 = vst [vmem:[#allocation9_spill] sm:$0xff] %v2498_v39  ;;  %2118 = vmatprep.subr.bf16.mxu0 %v2469_v29  ;;  %3041 = vst [vmem:[#allocation10_spill] sm:$0xff] %v2507_v42  ;;  %v2539_v52 = vrot.slane %v2483_v34, %v1258_v28  ;;  %v2541_v53 = vpack.c.bf16 %v510_v49, %v509_v48  ;;  %v494_v55 = vld [vmem:[%s2991_s2 + $0x48] sm:$0xff]  ;;  %v511_v56 = vld [vmem:[%s2991_s2 + $0xd0] sm:$0xff]  ;;  %v355_v28 = vsub.s32 0, %v2399_v5 }
  0x18   : > { %2265 = vset.pattern.permute.xlu1 %v2333_v33  ;;  %2267 = vset.pattern.permute.xlu0 %v2333_v33  ;;  %3042 = vst [vmem:[#allocation11_spill] sm:$0xff] %v2536_v51  ;;  %v512_v57 = vld [vmem:[%s2991_s2 + $0xd8] sm:$0xff]  ;;  %v331_v58 = vld [vmem:[%s2994_s5 + $0x10] sm:$0xff]  ;;  %v2560_v59 = vpack.c.bf16 %v494_v55, %v493_v54  ;;  %v513_v63 = vld [vmem:[%s2991_s2 + $0xe0] sm:$0xff]  ;;  %v2648_v54 = vrot.slane %v2483_v34, %v427_v30 }
  0x19   : > { %374 = vperm.xlu1 %2265, %v326_v9   ;;  %370 = vperm.xlu0 %2267, %v325_v0   ;;  %3043 = vst [vmem:[#allocation12_spill] sm:$0xff] %v2541_v53  ;;  %v2563_v60 = vpack.c.bf16 %v512_v57, %v511_v56  ;;  %v495_v61 = vld [vmem:[%s2991_s2 + $0x50] sm:$0xff]  ;;  %v496_v62 = vld [vmem:[%s2991_s2 + $0x58] sm:$0xff]  ;;  %v514_v0 = vld [vmem:[%s2991_s2 + $0xe8] sm:$0xff]  ;;  %v2654_v55 = vrot.slane %v2451_v22, %v355_v28 }
  0x1a   : > { %2120 = vmatpush3.bf16.msra.mxu0 %v2498_v39  ;;  %3044 = vst [vmem:[#allocation13_spill] sm:$0xff] %v2560_v59  ;;  %v2579_v1 = vpack.c.bf16 %v496_v62, %v495_v61  ;;  %v2582_v4 = vpack.c.bf16 %v514_v0, %v513_v63  ;;  %v497_v6 = vld [vmem:[%s2991_s2 + $0x60] sm:$0xff]  ;;  %v498_v7 = vld [vmem:[%s2991_s2 + $0x68] sm:$0xff]  ;;  %v515_v9 = vld [vmem:[%s2991_s2 + $0xf0] sm:$0xff]  ;;  %v2660_v57 = vrot.slane %v2451_v22, %v427_v30 }
  0x1b   : > { %2122 = vmatprep.subr.bf16.mxu0 %v2507_v42  ;;  %3045 = vst [vmem:[#allocation14_spill] sm:$0xff] %v2563_v60  ;;  %v330_v8 = vld [vmem:[%s2994_s5 + $0x8] sm:$0xff]  ;;  %v516_v11 = vld [vmem:[%s2991_s2 + $0xf8] sm:$0xff]  ;;  %v2601_v12 = vpack.c.bf16 %v498_v7, %v497_v6  ;;  %v499_v14 = vld [vmem:[%s2991_s2 + $0x70] sm:$0xff] }
  0x1c   : > { %3046 = vst [vmem:[#allocation15_spill] sm:$0xff] %v2579_v1  ;;  %3047 = vst [vmem:[#allocation16_spill] sm:$0xff] %v2582_v4  ;;  %v2604_v13 = vpack.c.bf16 %v516_v11, %v515_v9  ;;  %v500_v16 = vld [vmem:[%s2991_s2 + $0x78] sm:$0xff]  ;;  %v2624_v20 = vld [vmem:[%s2442_s10 + $0x10] ss:$0 sm:$0xff] }
  0x1d   : > { %2268 = vset.pattern.permute.xlu1 %v2332_v3  ;;  %378 = vperm.xlu0 %2267, %v327_v38   ;;  %3048 = vst [vmem:[#allocation17_spill] sm:$0xff] %v2601_v12  ;;  %v2613_v18 = vpack.c.bf16 %v500_v16, %v499_v14  ;;  %v332_v19 = vld [vmem:[%s2994_s5 + $0x18] sm:$0xff]  ;;  %3051 = vst [vmem:[#allocation20_spill] sm:$0xff] %v2624_v20 }
  0x1e   : > { %451 = vperm.xlu1 %2268, %v329_v41   ;;  %2124 = vmatpush3.bf16.msra.mxu0 %v2536_v51  ;;  %3049 = vst [vmem:[#allocation18_spill] sm:$0xff] %v2604_v13  ;;  %v2629_v31 = vld [vmem:[%s2442_s10 + $0x18] ss:$0 sm:$0xff]  ;;  %vm2845_vm2 = vmpackc.low %vm604_vm0, %vm604_vm0  ;;  %s320_s10 = scalar_lea.vmem %s2997_s8, %s1817_s25 }
  0x1f   : > { %2126 = vmatprep.subr.bf16.mxu0 %v2541_v53  ;;  %3050 = vst [vmem:[#allocation19_spill] sm:$0xff] %v2613_v18 }
  0x21   : > { %2271 = vset.pattern.permute.xlu0 %v2332_v3 }
  0x22   : > { %345 = vperm.xlu1 %2268, %v327_v38   ;;  %350 = vperm.xlu0 %2271, %v328_v50  }
  0x23   : > { %2128 = vmatpush3.bf16.msra.mxu0 %v2560_v59 }
  0x24   : > { %2130 = vmatprep.subr.bf16.mxu0 %v2563_v60 }
  0x26   : > { %2269 = vset.pattern.permute.xlu1 %v2331_v2  ;;  %461 = vperm.xlu0 %2271, %v331_v58  }
  0x27   : > { %418 = vperm.xlu1 %2269, %v327_v38   ;;  %2132 = vmatpush3.bf16.msra.mxu0 %v2579_v1 }
  0x28   : > { %2134 = vmatprep.subr.bf16.mxu0 %v2582_v4 }
  0x2b   : > { %2270 = vset.pattern.permute.xlu1 %v2332_v3  ;;  %2136 = vmatpush3.bf16.msra.mxu0 %v2601_v12 }
  0x2c   : > { %456 = vperm.xlu1 %2270, %v330_v8   ;;  %2138 = vmatprep.subr.bf16.mxu0 %v2604_v13 }
  0x2f   : > { %2140 = vmatpush3.bf16.msra.mxu0 %v2613_v18 }
  0x30   : > { %2272 = vset.pattern.permute.xlu1 %v2333_v33 }
  0x31   : > { %382 = vperm.xlu1 %2272, %v328_v50  }
  0x35   : > { %2273 = vset.pattern.permute.xlu1 %v2331_v2 }
  0x36   : > { %422 = vperm.xlu1 %2273, %v328_v50   ;;  %v2645_v50 = vrot.slane %v2483_v34, %v355_v28 }
  0x3a   : > { %2274 = vset.pattern.permute.xlu1 %v2332_v3  ;;  %v387_v3 = vsub.s32 1, %v2399_v5 }
  0x3b   : > { %466 = vperm.xlu1 %2274, %v332_v19  }
  0x3c   : > { %v2651_v5 = vrot.slane %v2483_v34, %v387_v3  ;;  %v2657_v56 = vrot.slane %v2451_v22, %v387_v3 }
  0x8e   : > { %v411_v21 = vpop.permute.xlu1 %410  ;;  %v336_v26 = vpop.permute.xlu0 %335 }
  0x8f   : > { %v873_v2 = vmul.f32 %v2455_v23, %v411_v21  ;;  %v1288_v33 = vmul.f32 %v2624_v20, %v411_v21  ;;  %v833_v35 = vmul.f32 %v2458_v24, %v336_v26  ;;  %v1248_v36 = vmul.f32 %v2461_v25, %v336_v26 }
  0x90   : > { %v834_v38 = vmul.f32 %v2501_v40, %v336_v26  ;;  %v874_v41 = vmul.f32 %v2513_v44, %v411_v21  ;;  %v2639_v46 = vmul.f32 %v2516_v45, %v336_v26  ;;  %v2642_v47 = vmul.f32 %v2629_v31, %v411_v21 }
  0x91   : > { %v362_v7 = vmul.f32 %v2645_v50, %v336_v26  ;;  %v361_v8 = vmul.f32 %v2654_v55, %v336_v26  ;;  %v434_v14 = vmul.f32 %v2648_v54, %v411_v21  ;;  %v433_v16 = vmul.f32 %v2660_v57, %v411_v21 }
  0x93   : > { %v341_v48 = vpop.permute.xlu1 %340  ;;  %v415_v49 = vpop.permute.xlu0 %414 }
  0x94   : > { %v836_v58 = vmul.f32 %v2501_v40, %v341_v48  ;;  %v876_v61 = vmul.f32 %v2513_v44, %v415_v49  ;;  %v835_v62 = vmul.f32 %v2458_v24, %v341_v48  ;;  %v2666_v63 = vmul.f32 %v2455_v23, %v415_v49 }
  0x95   : > { %v2669_v34 = vmul.f32 %v2516_v45, %v341_v48  ;;  %v2672_v0 = vmul.f32 %v2629_v31, %v415_v49  ;;  %v2675_v6 = vmul.f32 %v2461_v25, %v341_v48  ;;  %v2678_v22 = vmul.f32 %v2624_v20, %v415_v49 }
  0x96   : > { %v364_v19 = vmul.f32 %v2645_v50, %v341_v48  ;;  %v436_v51 = vmul.f32 %v2648_v54, %v415_v49  ;;  %v363_v42 = vmul.f32 %v2654_v55, %v341_v48  ;;  %v435_v20 = vmul.f32 %v2660_v57, %v415_v49 }
  0x98   : > { %v2682_v9 = vpop.permute.xlu1 %374  ;;  %v371_v11 = vpop.permute.xlu0 %370 }
  0x99   : > { %v849_v28 = vmul.f32 %v2478_v32, %v371_v11  ;;  %v1264_v30 = vmul.f32 %v2492_v37, %v371_v11  ;;  %v394_v3 = vmul.f32 %v2651_v5, %v371_v11  ;;  %v393_v18 = vmul.f32 %v2657_v56, %v371_v11 }
  0x9a   : > { %v396_v26 = vmul.f32 %v2651_v5, %v2682_v9  ;;  %v395_v13 = vmul.f32 %v2657_v56, %v2682_v9  ;;  %v850_v12 = vmul.f32 %v2510_v43, %v371_v11  ;;  %v852_v21 = vmul.f32 %v2510_v43, %v2682_v9 }
  0x9b   : > { %v1272_v4 = vadd.f32 %v1264_v30, %v1248_v36  ;;  %v402_v1 = vadd.f32 %v394_v3, %v362_v7  ;;  %v401_v60 = vadd.f32 %v393_v18, %v361_v8  ;;  %v857_v59 = vadd.f32 %v849_v28, %v833_v35 }
  0x9c   : > { %v2698_v53 = vpop.permute.xlu0 %378  ;;  %v858_v39 = vadd.f32 %v850_v12, %v834_v38  ;;  %v860_v29 = vadd.f32 %v852_v21, %v836_v58  ;;  %v404_v25 = vadd.f32 %v396_v26, %v364_v19  ;;  %v403_v36 = vadd.f32 %v395_v13, %v363_v42 }
  0x9d   : > { %v2702_v27 = vpop.permute.xlu1 %451  ;;  %v1296_v17 = vadd.f32 %v1288_v33, %v1272_v4  ;;  %v442_v15 = vadd.f32 %v434_v14, %v402_v1  ;;  %v441_v10 = vadd.f32 %v433_v16, %v401_v60  ;;  %v398_v18 = vmul.f32 %v2651_v5, %v2698_v53 }
  0x9e   : > { %v882_v35 = vadd.f32 %v874_v41, %v858_v39  ;;  %v881_v38 = vadd.f32 %v873_v2, %v857_v59  ;;  %v884_v60 = vadd.f32 %v876_v61, %v860_v29  ;;  %v851_v1 = vmul.f32 %v2478_v32, %v2682_v9 }
  0x9f   : > { %v2708_v7 = vadd.f32 %v1296_v17, %v2702_v27  ;;  %v470_v48 = vadd.f32 %v2702_v27, %v442_v15  ;;  %v469_v12 = vadd.f32 %v2702_v27, %v441_v10  ;;  %v854_v42 = vmul.f32 %v2510_v43, %v2698_v53 }
  0xa0   : > { %v2713_v4 = vadd.f32 %v882_v35, %v2702_v27  ;;  %v2722_v33 = vadd.f32 %v881_v38, %v2702_v27  ;;  %v853_v10 = vmul.f32 %v2478_v32, %v2698_v53  ;;  %v397_v2 = vmul.f32 %v2657_v56, %v2698_v53 }
  0xa1   : > { %v2719_v13 = vpop.permute.xlu1 %345  ;;  %v478_v39 = vmax.f32 %v470_v48, 0.0  ;;  %v477_v17 = vmax.f32 %v469_v12, 0.0  ;;  %v2726_v15 = vpop.permute.xlu0 %350  ;;  %v444_v41 = vadd.f32 %v436_v51, %v404_v25  ;;  %v859_v49 = vadd.f32 %v851_v1, %v835_v62 }
  0xa2   : > { %v366_v29 = vmul.f32 %v2645_v50, %v2719_v13  ;;  %v365_v59 = vmul.f32 %v2654_v55, %v2719_v13  ;;  %v838_v58 = vmul.f32 %v2501_v40, %v2719_v13  ;;  %v443_v61 = vadd.f32 %v435_v20, %v403_v36 }
  0xa3   : > { %581 = vmatprep.mubr.f32.mxu0 %v478_v39  ;;  %v837_v14 = vmul.f32 %v2458_v24, %v2719_v13  ;;  %v840_v16 = vmul.f32 %v2501_v40, %v2726_v15  ;;  %v883_v19 = vadd.f32 %v2666_v63, %v859_v49  ;;  %v839_v30 = vmul.f32 %v2458_v24, %v2726_v15 }
  0xa4   : > { %582 = vmatmul.mubr.f32.vlgmr.msra.gmra.mrb[0].mxu0 %v477_v17  ;;  %v406_v8 = vadd.f32 %v398_v18, %v366_v29  ;;  %v862_v28 = vadd.f32 %v854_v42, %v838_v58  ;;  %v1265_v25 = vmul.f32 %v2539_v52, %v371_v11  ;;  %v405_v62 = vadd.f32 %v397_v2, %v365_v59 }
  0xa5   : > { %v861_v3 = vadd.f32 %v853_v10, %v837_v14  ;;  %v1267_v20 = vmul.f32 %v2539_v52, %v2682_v9  ;;  %v1266_v26 = vmul.f32 %v2492_v37, %v2682_v9  ;;  %v2752_v24 = vpop.permute.xlu0 %461  ;;  %v1253_v48 = vmul.f32 %v2516_v45, %v2719_v13 }
  0xa6   : > { %v419_v51 = vpop.permute.xlu1 %418  ;;  %v1273_v11 = vadd.f32 %v1265_v25, %v2639_v46  ;;  %v1269_v46 = vmul.f32 %v2539_v52, %v2698_v53 }
  0xa7   : > { %v438_v21 = vmul.f32 %v2648_v54, %v419_v51  ;;  %v437_v40 = vmul.f32 %v2660_v57, %v419_v51  ;;  %v878_v63 = vmul.f32 %v2513_v44, %v419_v51  ;;  %v877_v36 = vmul.f32 %v2455_v23, %v419_v51 }
  0xa8   : > { %v1275_v18 = vadd.f32 %v1267_v20, %v2669_v34  ;;  %v1274_v35 = vadd.f32 %v1266_v26, %v2675_v6  ;;  %v1297_v42 = vadd.f32 %v2642_v47, %v1273_v11  ;;  %v3053_v20 = vld [vmem:[#allocation20_spill] sm:$0xff] }
  0xa9   : > { %v446_v9 = vadd.f32 %v438_v21, %v406_v8  ;;  %v445_v12 = vadd.f32 %v437_v40, %v405_v62  ;;  %v886_v38 = vadd.f32 %v878_v63, %v862_v28  ;;  %v885_v1 = vadd.f32 %v877_v36, %v861_v3  ;;  %v3052_v62 = vld [vmem:[#allocation6_spill] sm:$0xff] }
  0xaa   : > { %v1299_v39 = vadd.f32 %v2672_v0, %v1275_v18  ;;  %v1298_v17 = vadd.f32 %v2678_v22, %v1274_v35  ;;  %v368_v0 = vmul.f32 %v2645_v50, %v2726_v15  ;;  %v367_v22 = vmul.f32 %v2654_v55, %v2726_v15 }
  0xab   : > { %v457_v10 = vpop.permute.xlu1 %456  ;;  %v474_v34 = vadd.f32 %v2752_v24, %v446_v9  ;;  %v2766_v6 = vadd.f32 %v886_v38, %v2752_v24  ;;  %v2769_v29 = vadd.f32 %v885_v1, %v2752_v24  ;;  %v473_v28 = vadd.f32 %v2752_v24, %v445_v12 }
  0xac   : > { %v472_v59 = vadd.f32 %v457_v10, %v444_v41  ;;  %v471_v2 = vadd.f32 %v457_v10, %v443_v61  ;;  %v2771_v49 = vadd.f32 %v884_v60, %v457_v10  ;;  %v2773_v47 = vadd.f32 %v883_v19, %v457_v10 }
  0xad   : > { %v482_v14 = vmax.f32 %v474_v34, 0.0  ;;  %v2781_v25 = vadd.f32 %v1297_v42, %v2702_v27  ;;  %v2783_v41 = vadd.f32 %v1299_v39, %v457_v10  ;;  %v2785_v60 = vadd.f32 %v1298_v17, %v457_v10 }
  0xae   : > { %v480_v58 = vmax.f32 %v472_v59, 0.0  ;;  %v479_v8 = vmax.f32 %v471_v2, 0.0  ;;  %v1277_v61 = vadd.f32 %v1269_v46, %v1253_v48  ;;  %v1293_v50 = vmul.f32 %v2629_v31, %v419_v51 }
  0xaf   : > { %v1252_v55 = vmul.f32 %v3052_v62, %v2719_v13  ;;  %v1268_v3 = vmul.f32 %v2492_v37, %v2698_v53  ;;  %v1292_v26 = vmul.f32 %v3053_v20, %v419_v51  ;;  %v481_v11 = vmax.f32 %v473_v28, 0.0 }
  0xb0   : > { %v383_v19 = vpop.permute.xlu1 %382  ;;  %586 = vmatprep.mubr.f32.mxu0 %v480_v58  ;;  %v1301_v36 = vadd.f32 %v1293_v50, %v1277_v61  ;;  %v1255_v51 = vmul.f32 %v2516_v45, %v2726_v15 }
  0xb1   : > { %587 = vmatmul.mubr.f32.gmra.mrb[2].mxu0 %v479_v8  ;;  %v400_v27 = vmul.f32 %v2651_v5, %v383_v19  ;;  %v399_v21 = vmul.f32 %v2657_v56, %v383_v19  ;;  %v856_v40 = vmul.f32 %v2510_v43, %v383_v19  ;;  %v855_v63 = vmul.f32 %v2478_v32, %v383_v19  ;;  %v603_v8 = vld [vmem:[%s2992_s3 + $0x8] sm:$0xff] }
  0xb2   : > { %591 = vmatprep.mubr.f32.mxu0 %v482_v14  ;;  %v2798_v13 = vadd.f32 %v1301_v36, %v2752_v24  ;;  %v1276_v53 = vadd.f32 %v1268_v3, %v1252_v55  ;;  %v1271_v5 = vmul.f32 %v2539_v52, %v383_v19  ;;  %v1254_v32 = vmul.f32 %v3052_v62, %v2726_v15 }
  0xb3   : > { %v864_v18 = vadd.f32 %v856_v40, %v840_v16  ;;  %v863_v35 = vadd.f32 %v855_v63, %v839_v30  ;;  %v408_v56 = vadd.f32 %v400_v27, %v368_v0  ;;  %v407_v43 = vadd.f32 %v399_v21, %v367_v22 }
  0xb4   : > { %v1270_v9 = vmul.f32 %v2492_v37, %v383_v19  ;;  %v1300_v45 = vadd.f32 %v1292_v26, %v1276_v53  ;;  %v1279_v1 = vadd.f32 %v1271_v5, %v1255_v51  ;;  %v2334_v63 = vmov 0.0|0.0  }
  0xb5   : > { %v423_v48 = vpop.permute.xlu1 %422  ;;  %592 = vmatmul.mubr.f32.gmra.mrb[4].mxu0 %v481_v11  ;;  %v2336_v36 = vmov 0.0  }
  0xb6   : > { %v440_v16 = vmul.f32 %v2648_v54, %v423_v48  ;;  %v439_v30 = vmul.f32 %v2660_v57, %v423_v48  ;;  %v880_v12 = vmul.f32 %v2513_v44, %v423_v48  ;;  %v879_v38 = vmul.f32 %v2455_v23, %v423_v48 }
  0xb7   : > { %v1295_v52 = vmul.f32 %v2629_v31, %v423_v48  ;;  %v2812_v15 = vadd.f32 %v1300_v45, %v2752_v24  ;;  %v1278_v10 = vadd.f32 %v1270_v9, %v1254_v32  ;;  %v1294_v54 = vmul.f32 %v3053_v20, %v423_v48  ;;  %v602_v24 = vld [vmem:[%s2992_s3] sm:$0xff] }
  0xb8   : > { %v448_v42 = vadd.f32 %v440_v16, %v408_v56  ;;  %v447_v39 = vadd.f32 %v439_v30, %v407_v43  ;;  %v888_v17 = vadd.f32 %v880_v12, %v864_v18  ;;  %v887_v46 = vadd.f32 %v879_v38, %v863_v35 }
  0xb9   : > { %v1303_v37 = vadd.f32 %v1295_v52, %v1279_v1  ;;  %v1302_v31 = vadd.f32 %v1294_v54, %v1278_v10  ;;  %v2829_v14 = vpack.c.bf16 %v603_v8, %v602_v24 }
  0xba   : > { %v467_v57 = vpop.permute.xlu1 %466 }
  0xbb   : > { %v476_v34 = vadd.f32 %v467_v57, %v448_v42  ;;  %v475_v44 = vadd.f32 %v467_v57, %v447_v39  ;;  %v2815_v59 = vadd.f32 %v888_v17, %v467_v57  ;;  %v2817_v23 = vadd.f32 %v887_v46, %v467_v57  ;;  %2142 = vmatprep.subr.bf16.mxu1 %v2829_v14 }
  0xbc   : > { %v2819_v2 = vadd.f32 %v1303_v37, %v467_v57  ;;  %v2821_v58 = vadd.f32 %v1302_v31, %v467_v57  ;;  %2186 = vmatprep.subr.bf16.mxu0 %v2829_v14  ;;  %2144 = vmatpush3.bf16.msra.mxu1 %v2829_v14 }
  0xbd   : > { %v484_v0 = vmax.f32 %v476_v34, 0.0  ;;  %v483_v22 = vmax.f32 %v475_v44, 0.0  ;;  %2188 = vmatpush3.bf16.msra.mxu0 %v2829_v14  ;;  %2145 = vmatprep.subr.bf16.mxu1 %v2334_v63  ;;  %v1658_v34 = vld [vmem:[%s2995_s6 + $0x10] sm:$0xff] }
  0xbe   : > { %2189 = vmatprep.subr.bf16.mxu0 %v2334_v63 }
  0xbf   : > { %596 = vmatprep.mubr.f32.mxu0 %v484_v0 }
  0xc0   : > { %597 = vmatmul.mubr.f32.gmra.mrb[6].mxu0 %v483_v22 }
 0x177   : > { %v1897_v28 = vpop.f32.mrb[0].mxu0 }
 0x178   : > { %v1898_v61 = vpop.f32.mrb[1].mxu0 }
 0x179   : > { %v1899_v19 = vadd.f32 %v1898_v61, %v1897_v28 }
 0x17b   : > { %2039 = vmatprep.mubr.msk.f32.mxu1 %vm604_vm0, %v1899_v19 }
 0x184   : > { %v1900_v50 = vpop.f32.mrb[2].mxu0 }
 0x185   : > { %v1901_v62 = vpop.f32.mrb[3].mxu0 }
 0x186   : > { %v1902_v55 = vadd.f32 %v1901_v62, %v1900_v50  ;;  %v898_v50 = vmax.f32 %v2713_v4, 0.0  ;;  %v2337_v62 = vmov 0.0625   ;;  %v3064_v4 = vld [vmem:[#allocation12_spill] sm:$0xff] }
 0x188   : > { %v1903_v3 = vpop.f32.mrb[4].mxu0  ;;  %2040 = vmatmul.mubr.msk.f32.vlgmr.msra.gmra.mrb[0].mxu1 %vm604_vm0, %v1902_v55 }
 0x189   : > { %v1904_v20 = vpop.f32.mrb[5].mxu0 }
 0x18a   : > { %v1905_v26 = vadd.f32 %v1904_v20, %v1903_v3  ;;  %v3058_v3 = vld [vmem:[#allocation5_spill] sm:$0xff]  ;;  %v3059_v20 = vld [vmem:[#allocation7_spill] sm:$0xff] }
 0x18c   : > { %2042 = vmatprep.mubr.msk.f32.mxu1 %vm604_vm0, %v1905_v26 }
 0x193   : > { %v1906_v27 = vpop.f32.mrb[6].mxu0 }
 0x194   : > { %v1907_v21 = vpop.f32.mrb[7].mxu0 }
 0x195   : > { %v1908_v40 = vadd.f32 %v1907_v21, %v1906_v27  ;;  %v3061_v27 = vld [vmem:[#allocation9_spill] sm:$0xff]  ;;  %v3062_v21 = vld [vmem:[#allocation10_spill] sm:$0xff] }
 0x197   : > { %2043 = vmatmul.mubr.msk.f32.gmra.mrb[2].mxu1 %vm604_vm0, %v1908_v40 }
 0x198   : > { %2053 = vmatprep.mubr.msk.f32.mxu1 %vm2335_vm1, %v2336_v36 }
 0x25b   : > { %v2041_v11 = vpop.f32.mrb[0].mxu1 }
 0x25c   : > { %v703_v18 = vsub.f32 %v1902_v55, %v2041_v11  ;;  %v683_v35 = vpop.f32.mrb[1].mxu1  ;;  %v3065_v11 = vld [vmem:[#allocation13_spill] sm:$0xff] }
 0x25d   : > { %v702_v53 = vsub.f32 %v1899_v19, %v683_v35  ;;  %v3067_v35 = vld [vmem:[#allocation15_spill] sm:$0xff] }
 0x25e   : > { %v1824_v51 = vmul.f32 -1.442695, %v703_v18  ;;  %v3066_v18 = vld [vmem:[#allocation14_spill] sm:$0xff] }
 0x25f   : > { %v1823_v5 = vmul.f32 -1.442695, %v702_v53  ;;  %v3068_v53 = vld [vmem:[#allocation16_spill] sm:$0xff] }
 0x260   : > { %2275 = vpow2.f32 %v1824_v51  ;;  %v3069_v51 = vld [vmem:[#allocation17_spill] sm:$0xff] }
 0x261   : > { %2277 = vpow2.f32 %v1823_v5  ;;  %v3070_v5 = vld [vmem:[#allocation18_spill] sm:$0xff] }
 0x26a   : > { %v2276_v48 = vpop.eup %2275  ;;  %v2044_v56 = vpop.f32.mrb[2].mxu1 }
 0x26b   : > { %v2278_v43 = vpop.eup %2277  ;;  %v719_v32 = vadd.f32 1.0, %v2276_v48  ;;  %v705_v9 = vsub.f32 %v1908_v40, %v2044_v56  ;;  %v693_v16 = vpop.f32.mrb[3].mxu1  ;;  %v3071_v48 = vld [vmem:[#allocation19_spill] sm:$0xff]  ;;  %v897_v56 = vmax.f32 %v2722_v33, 0.0  ;;  %v901_v33 = vmax.f32 %v2769_v29, 0.0 }
 0x26c   : > { %v718_v30 = vadd.f32 1.0, %v2278_v43  ;;  %v704_v12 = vsub.f32 %v1905_v26, %v693_v16  ;;  %v900_v43 = vmax.f32 %v2771_v49, 0.0  ;;  %v904_v49 = vmax.f32 %v2815_v59, 0.0 }
 0x26d   : > { %2279 = vrcp.f32 %v719_v32  ;;  %v1826_v38 = vmul.f32 -1.442695, %v705_v9  ;;  %v899_v32 = vmax.f32 %v2773_v47, 0.0  ;;  %v902_v9 = vmax.f32 %v2766_v6, 0.0 }
 0x26e   : > { %2281 = vrcp.f32 %v718_v30  ;;  %v1825_v45 = vmul.f32 -1.442695, %v704_v12  ;;  %v903_v47 = vmax.f32 %v2817_v23, 0.0  ;;  %v1313_v6 = vmax.f32 %v2781_v25, 0.0 }
 0x26f   : > { %2283 = vpow2.f32 %v1826_v38  ;;  %v1312_v29 = vmax.f32 %v2708_v7, 0.0  ;;  %v1315_v25 = vmax.f32 %v2783_v41, 0.0  ;;  %v1314_v59 = vmax.f32 %v2785_v60, 0.0 }
 0x270   : > { %2285 = vpow2.f32 %v1825_v45  ;;  %v1317_v23 = vmax.f32 %v2798_v13, 0.0  ;;  %v1316_v16 = vmax.f32 %v2812_v15, 0.0  ;;  %v1319_v30 = vmax.f32 %v2819_v2, 0.0 }
 0x271   : > { %v1318_v12 = vmax.f32 %v2821_v58, 0.0 }
 0x277   : > { %v2280_v1 = vpop.eup %2279 }
 0x278   : > { %v2282_v52 = vpop.eup %2281  ;;  %v731_v42 = vmul.f32 %v2280_v1, %v1902_v55 }
 0x279   : > { %v2284_v39 = vpop.eup %2283  ;;  %v730_v17 = vmul.f32 %v2282_v52, %v1899_v19 }
 0x27a   : > { %v2286_v46 = vpop.eup %2285  ;;  %v721_v37 = vadd.f32 1.0, %v2284_v39  ;;  %v735_v10 = vadd.f32 %v1902_v55, %v731_v42  ;;  %v3057_v55 = vld [vmem:[#allocation4_spill] sm:$0xff] }
 0x27b   : > { %v720_v54 = vadd.f32 1.0, %v2286_v46  ;;  %v734_v57 = vadd.f32 %v1899_v19, %v730_v17  ;;  %v3056_v19 = vld [vmem:[#allocation3_spill] sm:$0xff] }
 0x27c   : > { %2287 = vrcp.f32 %v721_v37 }
 0x27d   : > { %2289 = vrcp.f32 %v720_v54  ;;  %v2146_v44 = vpack.c.bf16 %v735_v10, %v734_v57 }
 0x27f   : > { %2148 = vmatpush3.bf16.xpose.msk.msra.mxu1 %vm2845_vm2, %v2146_v44 }
 0x280   : > { %2149 = vmatprep.subr.bf16.mxu1 %v2334_v63 }
 0x286   : > { %v2288_v31 = vpop.eup %2287 }
 0x287   : > { %v2290_v0 = vpop.eup %2289  ;;  %v733_v22 = vmul.f32 %v2288_v31, %v1908_v40 }
 0x288   : > { %v732_v24 = vmul.f32 %v2290_v0, %v1905_v26 }
 0x289   : > { %v737_v8 = vadd.f32 %v1908_v40, %v733_v22  ;;  %v3063_v40 = vld [vmem:[#allocation11_spill] sm:$0xff] }
 0x28a   : > { %v736_v28 = vadd.f32 %v1905_v26, %v732_v24  ;;  %v3060_v26 = vld [vmem:[#allocation8_spill] sm:$0xff] }
 0x28c   : > { %v2150_v61 = vpack.c.bf16 %v737_v8, %v736_v28 }
 0x28e   : > { %2152 = vmatpush3.bf16.xpose.msk.msra.mxu1 %vm2845_vm2, %v2150_v61 }
 0x28f   : > { %2154 = vmatprep.subr.bf16.mxu1 %v3056_v19 }
 0x295   : > { %2054 = vmatmul.mubr.msk.f32.vlgmr.msra.gmra.mrb[4].mxu1 %vm604_vm0, %v2337_v62 }
 0x296   : > { %2156 = vmatpush3.bf16.msra.mxu1 %v3057_v55  ;;  %1001 = vmatprep.mubr.f32.mxu1 %v898_v50 }
 0x297   : > { %2158 = vmatprep.subr.bf16.mxu1 %v3058_v3 }
 0x29a   : > { %2160 = vmatpush3.bf16.msra.mxu1 %v3059_v20 }
 0x29b   : > { %2162 = vmatprep.subr.bf16.mxu1 %v3060_v26 }
 0x29e   : > { %2164 = vmatpush3.bf16.msra.mxu1 %v3061_v27 }
 0x29f   : > { %2166 = vmatprep.subr.bf16.mxu1 %v3062_v21 }
 0x2a2   : > { %2168 = vmatpush3.bf16.msra.mxu1 %v3063_v40 }
 0x2a3   : > { %2170 = vmatprep.subr.bf16.mxu1 %v3064_v4 }
 0x2a6   : > { %2172 = vmatpush3.bf16.msra.mxu1 %v3065_v11 }
 0x2a7   : > { %2174 = vmatprep.subr.bf16.mxu1 %v3066_v18 }
 0x2aa   : > { %2176 = vmatpush3.bf16.msra.mxu1 %v3067_v35 }
 0x2ab   : > { %2178 = vmatprep.subr.bf16.mxu1 %v3068_v53 }
 0x2ae   : > { %2180 = vmatpush3.bf16.msra.mxu1 %v3069_v51 }
 0x2af   : > { %2182 = vmatprep.subr.bf16.mxu1 %v3070_v5 }
 0x2b2   : > { %2184 = vmatpush3.bf16.msra.mxu1 %v3071_v48 }
 0x2b3   : > { %2198 = vmatprep.subr.bf16.mxu1 %v3056_v19 }
 0x2b5   : > { %1002 = vmatmul.mubr.f32.vlgmr.msra.gmra.mrb[6].mxu1 %v897_v56 }
 0x2b6   : > { %1006 = vmatprep.mubr.f32.mxu1 %v900_v43  ;;  %2200 = vmatpush3.bf16.msra.mxu1 %v3057_v55 }
 0x2b7   : > { %2202 = vmatprep.subr.bf16.mxu1 %v3058_v3 }
 0x2b9   : > { %1007 = vmatmul.mubr.f32.gmra.mrb[8].mxu1 %v899_v32 }
 0x2ba   : > { %1011 = vmatprep.mubr.f32.mxu1 %v902_v9  ;;  %2204 = vmatpush3.bf16.msra.mxu1 %v3059_v20 }
 0x2bb   : > { %2206 = vmatprep.subr.bf16.mxu1 %v3060_v26 }
 0x2bd   : > { %1012 = vmatmul.mubr.f32.gmra.mrb[10].mxu1 %v901_v33 }
 0x2be   : > { %1016 = vmatprep.mubr.f32.mxu1 %v904_v49  ;;  %2208 = vmatpush3.bf16.msra.mxu1 %v3061_v27 }
 0x2bf   : > { %2210 = vmatprep.subr.bf16.mxu1 %v3062_v21 }
 0x2c1   : > { %1017 = vmatmul.mubr.f32.gmra.mrb[12].mxu1 %v903_v47 }
 0x2c2   : > { %2212 = vmatpush3.bf16.msra.mxu1 %v3063_v40  ;;  %1416 = vmatprep.mubr.f32.mxu1 %v1313_v6 }
 0x2c3   : > { %2214 = vmatprep.subr.bf16.mxu1 %v3064_v4 }
 0x2c6   : > { %2216 = vmatpush3.bf16.msra.mxu1 %v3065_v11 }
 0x2c7   : > { %2218 = vmatprep.subr.bf16.mxu1 %v3066_v18 }
 0x2ca   : > { %2220 = vmatpush3.bf16.msra.mxu1 %v3067_v35 }
 0x2cb   : > { %2222 = vmatprep.subr.bf16.mxu1 %v3068_v53 }
 0x2ce   : > { %2224 = vmatpush3.bf16.msra.mxu1 %v3069_v51 }
 0x2cf   : > { %2226 = vmatprep.subr.bf16.mxu1 %v3070_v5 }
 0x2d2   : > { %2228 = vmatpush3.bf16.msra.mxu1 %v3071_v48 }
 0x2d5   : > { %1417 = vmatmul.mubr.f32.vlgmr.msra.gmra.mrb[14].mxu1 %v1312_v29 }
 0x2d6   : > { %1421 = vmatprep.mubr.f32.mxu1 %v1315_v25 }
 0x2d9   : > { %1422 = vmatmul.mubr.f32.gmra.mrb[16].mxu1 %v1314_v59 }
 0x2da   : > { %1426 = vmatprep.mubr.f32.mxu1 %v1317_v23 }
 0x2dd   : > { %1427 = vmatmul.mubr.f32.gmra.mrb[18].mxu1 %v1316_v16 }
 0x2de   : > { %1431 = vmatprep.mubr.f32.mxu1 %v1319_v30 }
 0x2e1   : > { %1432 = vmatmul.mubr.f32.gmra.mrb[20].mxu1 %v1318_v12 }
 0x368   : > { %v819_v7 = vpop.f32.mrb[4].mxu1 }
 0x369   : > { %824 = vst.msk [vmem:[#allocation2] sm:$0x1] %vm823_vm3, %v819_v7  ;;  %v2055_v41 = vpop.f32.mrb[5].mxu1 }
 0x388   : > { %v1952_v38 = vpop.f32.mrb[6].mxu1 }
 0x389   : > { %v1953_v60 = vpop.f32.mrb[7].mxu1 }
 0x38a   : > { %v1954_v45 = vadd.f32 %v1953_v60, %v1952_v38 }
 0x38c   : > { %v1955_v13 = vpop.f32.mrb[8].mxu1  ;;  %2060 = vmatprep.mubr.msk.f32.mxu0 %vm604_vm0, %v1954_v45 }
 0x38d   : > { %v1956_v1 = vpop.f32.mrb[9].mxu1 }
 0x38e   : > { %v1957_v15 = vadd.f32 %v1956_v1, %v1955_v13 }
 0x390   : > { %v1958_v52 = vpop.f32.mrb[10].mxu1  ;;  %2061 = vmatmul.mubr.msk.f32.vlgmr.msra.gmra.mrb[8].mxu0 %vm604_vm0, %v1957_v15 }
 0x391   : > { %v1959_v2 = vpop.f32.mrb[11].mxu1 }
 0x392   : > { %v1960_v42 = vadd.f32 %v1959_v2, %v1958_v52 }
 0x394   : > { %v1961_v58 = vpop.f32.mrb[12].mxu1  ;;  %2063 = vmatprep.mubr.msk.f32.mxu0 %vm604_vm0, %v1960_v42 }
 0x395   : > { %v1962_v39 = vpop.f32.mrb[13].mxu1 }
 0x396   : > { %v1963_v17 = vadd.f32 %v1962_v39, %v1961_v58 }
 0x398   : > { %2064 = vmatmul.mubr.msk.f32.gmra.mrb[10].mxu0 %vm604_vm0, %v1963_v17 }
 0x399   : > { %2074 = vmatprep.mubr.msk.f32.mxu0 %vm2335_vm1, %v2336_v36 }
 0x3a8   : > { %v2007_v46 = vpop.f32.mrb[14].mxu1 }
 0x3a9   : > { %v2008_v37 = vpop.f32.mrb[15].mxu1 }
 0x3aa   : > { %v2911_v10 = vadd.f32 %v2008_v37, %v2007_v46 }
 0x3ac   : > { %v2010_v54 = vpop.f32.mrb[16].mxu1 }
 0x3ad   : > { %v2011_v57 = vpop.f32.mrb[17].mxu1 }
 0x3ae   : > { %v2913_v44 = vadd.f32 %v2011_v57, %v2010_v54 }
 0x3b0   : > { %v2013_v31 = vpop.f32.mrb[18].mxu1 }
 0x3b1   : > { %v2014_v0 = vpop.f32.mrb[19].mxu1 }
 0x3b2   : > { %v2915_v22 = vadd.f32 %v2014_v0, %v2013_v31 }
 0x3b4   : > { %v2016_v24 = vpop.f32.mrb[20].mxu1 }
 0x3b5   : > { %v2017_v8 = vpop.f32.mrb[21].mxu1 }
 0x3b6   : > { %v2917_v28 = vadd.f32 %v2017_v8, %v2016_v24 }
 0x463   : > { %v2062_v61 = vpop.f32.mrb[8].mxu0 }
 0x464   : > { %v1122_v19 = vsub.f32 %v1957_v15, %v2062_v61  ;;  %v1102_v50 = vpop.f32.mrb[9].mxu0 }
 0x465   : > { %v1121_v55 = vsub.f32 %v1954_v45, %v1102_v50 }
 0x466   : > { %v1837_v3 = vmul.f32 -1.442695, %v1122_v19 }
 0x467   : > { %v1836_v20 = vmul.f32 -1.442695, %v1121_v55 }
 0x468   : > { %2291 = vpow2.f32 %v1837_v3 }
 0x469   : > { %2293 = vpow2.f32 %v1836_v20 }
 0x46b   : > { %v2065_v26 = vpop.f32.mrb[10].mxu0 }
 0x46c   : > { %v1124_v27 = vsub.f32 %v1963_v17, %v2065_v26  ;;  %v1112_v21 = vpop.f32.mrb[11].mxu0 }
 0x46d   : > { %v1123_v40 = vsub.f32 %v1960_v42, %v1112_v21 }
 0x46e   : > { %v1839_v4 = vmul.f32 -1.442695, %v1124_v27 }
 0x46f   : > { %v1838_v11 = vmul.f32 -1.442695, %v1123_v40 }
 0x470   : > { %2295 = vpow2.f32 %v1839_v4 }
 0x471   : > { %2297 = vpow2.f32 %v1838_v11 }
 0x472   : > { %v2292_v18 = vpop.eup %2291 }
 0x473   : > { %v2294_v35 = vpop.eup %2293  ;;  %v1138_v53 = vadd.f32 1.0, %v2292_v18 }
 0x474   : > { %v1137_v51 = vadd.f32 1.0, %v2294_v35 }
 0x475   : > { %2299 = vrcp.f32 %v1138_v53 }
 0x476   : > { %2301 = vrcp.f32 %v1137_v51 }
 0x47a   : > { %v2296_v5 = vpop.eup %2295 }
 0x47b   : > { %v2298_v48 = vpop.eup %2297  ;;  %v1140_v56 = vadd.f32 1.0, %v2296_v5  ;;  %v1860_v5 = vld [vmem:[%s2996_s7] ss:$0 sm:$0xff] }
 0x47c   : > { %v1139_v43 = vadd.f32 1.0, %v2298_v48 }
 0x47d   : > { %2303 = vrcp.f32 %v1140_v56  ;;  %v1741_v56 = vld [vmem:[%s316_s30] sm:$0x7] }
 0x47e   : > { %2305 = vrcp.f32 %v1139_v43 }
 0x47f   : > { %v2300_v32 = vpop.eup %2299 }
 0x480   : > { %v2302_v9 = vpop.eup %2301  ;;  %v1150_v33 = vmul.f32 %v2300_v32, %v1957_v15 }
 0x481   : > { %v1149_v49 = vmul.f32 %v2302_v9, %v1954_v45 }
 0x482   : > { %v1154_v47 = vadd.f32 %v1957_v15, %v1150_v33 }
 0x483   : > { %v1153_v6 = vadd.f32 %v1954_v45, %v1149_v49 }
 0x485   : > { %v2190_v29 = vpack.c.bf16 %v1154_v47, %v1153_v6 }
 0x487   : > { %v2304_v25 = vpop.eup %2303  ;;  %2192 = vmatpush3.bf16.xpose.msk.msra.mxu0 %vm2845_vm2, %v2190_v29 }
 0x488   : > { %v2306_v59 = vpop.eup %2305  ;;  %v1152_v23 = vmul.f32 %v2304_v25, %v1963_v17  ;;  %2193 = vmatprep.subr.bf16.mxu0 %v2334_v63 }
 0x489   : > { %v1151_v16 = vmul.f32 %v2306_v59, %v1960_v42 }
 0x48a   : > { %v1156_v30 = vadd.f32 %v1963_v17, %v1152_v23 }
 0x48b   : > { %v1155_v12 = vadd.f32 %v1960_v42, %v1151_v16 }
 0x48d   : > { %v2194_v7 = vpack.c.bf16 %v1156_v30, %v1155_v12 }
 0x48f   : > { %2196 = vmatpush3.bf16.xpose.msk.msra.mxu0 %vm2845_vm2, %v2194_v7 }
 0x490   : > { %2230 = vmatprep.subr.bf16.mxu0 %v2829_v14 }
 0x496   : > { %2075 = vmatmul.mubr.msk.f32.vlgmr.msra.gmra.mrb[12].mxu0 %vm604_vm0, %v2337_v62 }
 0x497   : > { %2232 = vmatpush3.bf16.msra.mxu0 %v2829_v14  ;;  %2081 = vmatprep.mubr.msk.f32.mxu0 %vm604_vm0, %v2911_v10 }
 0x498   : > { %2233 = vmatprep.subr.bf16.mxu0 %v2334_v63 }
 0x49a   : > { %2082 = vmatmul.mubr.msk.f32.vlgmr.msra.gmra.mrb[14].mxu0 %vm604_vm0, %v2913_v44 }
 0x49b   : > { %2084 = vmatprep.mubr.msk.f32.mxu0 %vm604_vm0, %v2915_v22 }
 0x49e   : > { %2085 = vmatmul.mubr.msk.f32.gmra.mrb[16].mxu0 %vm604_vm0, %v2917_v28 }
 0x49f   : > { %2095 = vmatprep.mubr.msk.f32.mxu0 %vm2335_vm1, %v2336_v36 }
 0x569   : > { %v1235_v41 = vpop.f32.mrb[12].mxu0 }
 0x56a   : > { %1239 = vst.msk [vmem:[#allocation2 + $0x1] sm:$0x1] %vm823_vm3, %v1235_v41  ;;  %v2076_v14 = vpop.f32.mrb[13].mxu0 }
 0x56d   : > { %v2083_v38 = vpop.f32.mrb[14].mxu0 }
 0x56e   : > { %v1537_v60 = vsub.f32 %v2913_v44, %v2083_v38  ;;  %v1517_v45 = vpop.f32.mrb[15].mxu0 }
 0x56f   : > { %v1536_v13 = vsub.f32 %v2911_v10, %v1517_v45 }
 0x570   : > { %v1852_v1 = vmul.f32 -1.442695, %v1537_v60 }
 0x571   : > { %v1851_v15 = vmul.f32 -1.442695, %v1536_v13  ;;  %v2086_v52 = vpop.f32.mrb[16].mxu0 }
 0x572   : > { %2307 = vpow2.f32 %v1852_v1  ;;  %v1539_v2 = vsub.f32 %v2917_v28, %v2086_v52  ;;  %v1527_v42 = vpop.f32.mrb[17].mxu0 }
 0x573   : > { %2309 = vpow2.f32 %v1851_v15  ;;  %v1538_v58 = vsub.f32 %v2915_v22, %v1527_v42 }
 0x574   : > { %v1854_v39 = vmul.f32 -1.442695, %v1539_v2 }
 0x575   : > { %v1853_v17 = vmul.f32 -1.442695, %v1538_v58 }
 0x576   : > { %2311 = vpow2.f32 %v1854_v39 }
 0x577   : > { %2313 = vpow2.f32 %v1853_v17 }
 0x57c   : > { %v2308_v46 = vpop.eup %2307 }
 0x57d   : > { %v2310_v37 = vpop.eup %2309  ;;  %v1553_v54 = vadd.f32 1.0, %v2308_v46 }
 0x57e   : > { %v1552_v57 = vadd.f32 1.0, %v2310_v37 }
 0x57f   : > { %2315 = vrcp.f32 %v1553_v54 }
 0x580   : > { %v2312_v31 = vpop.eup %2311  ;;  %2317 = vrcp.f32 %v1552_v57 }
 0x581   : > { %v2314_v0 = vpop.eup %2313  ;;  %v1555_v24 = vadd.f32 1.0, %v2312_v31 }
 0x582   : > { %v1554_v8 = vadd.f32 1.0, %v2314_v0 }
 0x583   : > { %2319 = vrcp.f32 %v1555_v24 }
 0x584   : > { %2321 = vrcp.f32 %v1554_v8 }
 0x589   : > { %v2316_v61 = vpop.eup %2315 }
 0x58a   : > { %v2318_v19 = vpop.eup %2317  ;;  %v1565_v50 = vmul.f32 %v2316_v61, %v2913_v44 }
 0x58b   : > { %v1564_v55 = vmul.f32 %v2318_v19, %v2911_v10 }
 0x58c   : > { %v1569_v3 = vadd.f32 %v2913_v44, %v1565_v50  ;;  %v1657_v44 = vld [vmem:[%s2995_s6 + $0x8] sm:$0xff] }
 0x58d   : > { %v2320_v20 = vpop.eup %2319  ;;  %v1568_v26 = vadd.f32 %v2911_v10, %v1564_v55  ;;  %v1656_v10 = vld [vmem:[%s2995_s6] sm:$0xff] }
 0x58e   : > { %v2322_v27 = vpop.eup %2321  ;;  %v1567_v21 = vmul.f32 %v2320_v20, %v2917_v28 }
 0x58f   : > { %v1566_v40 = vmul.f32 %v2322_v27, %v2915_v22  ;;  %v2234_v4 = vpack.c.bf16 %v1569_v3, %v1568_v26 }
 0x590   : > { %v1571_v11 = vadd.f32 %v2917_v28, %v1567_v21 }
 0x591   : > { %2236 = vmatpush3.bf16.xpose.msk.msra.mxu0 %vm2845_vm2, %v2234_v4  ;;  %v1570_v18 = vadd.f32 %v2915_v22, %v1566_v40  ;;  %v2242_v22 = vpack.c.bf16 %v1657_v44, %v1656_v10 }
 0x592   : > { %2237 = vmatprep.subr.bf16.mxu0 %v2334_v63 }
 0x593   : > { %v2238_v35 = vpack.c.bf16 %v1571_v11, %v1570_v18 }
 0x599   : > { %2240 = vmatpush3.bf16.xpose.msk.msra.mxu0 %vm2845_vm2, %v2238_v35 }
 0x59a   : > { %2241 = vmatprep.subr.bf16.mxu0 %v2334_v63 }
 0x5a0   : > { %2096 = vmatmul.mubr.msk.f32.vlgmr.msra.gmra.mrb[18].mxu0 %vm604_vm0, %v2337_v62  ;;  %v1659_v62 = vld [vmem:[%s2995_s6 + $0x18] sm:$0xff] }
 0x5a1   : > { %2106 = vmatprep.mubr.msk.f32.mxu0 %vm2335_vm1, %v2336_v36  ;;  %2243 = vmatpush3.bf16.msra.mxu0 %v2242_v22  ;;  %v2245_v36 = vpack.c.bf16 %v1659_v62, %v1658_v34 }
 0x5a2   : > { %2244 = vmatprep.subr.bf16.mxu0 %v2334_v63 }
 0x5a5   : > { %2246 = vmatpush3.bf16.msra.mxu0 %v2245_v36 }
 0x673   : > { %v1650_v28 = vpop.f32.mrb[18].mxu0 }
 0x674   : > { %1654 = vst.msk [vmem:[#allocation2 + $0x2] sm:$0x1] %vm823_vm3, %v1650_v28  ;;  %v2097_v53 = vpop.f32.mrb[19].mxu0 }
 0x67b   : > { %v1655_v51 = vld [vmem:[#allocation2] sm:$0x7] }
 0x67c   : > { %2107 = vmatmul.mubr.msk.f32.vlgmr.msra.gmra.mrb[20].mxu0 %vm1667_vm4, %v1655_v51 }
 0x74f   : > { %v1737_v48 = vpop.f32.mrb[20].mxu0 }
 0x750   : > { %v1738_v63 = vadd.f32 %v1860_v5, %v1737_v48  ;;  %v2108_v43 = vpop.f32.mrb[21].mxu0 }
 0x752   : > { %v1742_v32 = vadd.f32 %v1741_v56, %v1738_v63 }
 0x754   : > { %1744 = vst.msk [vmem:[%s320_s10] sm:$0x7] %vm1743_vm5, %v1742_v32 }
 0x755 PF: > { %s18_s27 = sadd.s32 1, %s2329_s27  }
 0x756   : > { %p15_p4 = scmp.ge.s32.totalorder %s18_s27, 4  }
 0x758   :  { %17 = sbr.rel (!%p15_p4) target bundleno = 1 (0x1), region = 85 }

</bundles_post_ra>
